<compile_context>
chip_gen: v6e
topology: v6e:2x2x1
jax: 0.10.0
libtpu: 0.0.40
codegen_flags: <defaults>
</compile_context>

<pallas_src>
import functools

import jax
import jax.numpy as jnp
from jax.experimental import pallas as pl
from jax.experimental.pallas import tpu as pltpu


def _round_up(x, m):
    return ((x + m - 1) // m) * m


@functools.lru_cache(maxsize=None)
def _vmem_capacity_bytes():
    """Physical per-TensorCore VMEM; conservative 64 MiB if the query fails."""
    try:
        return int(pltpu.get_tpu_info().vmem_capacity_bytes)
    except Exception:
        return 64 << 20


@functools.lru_cache(maxsize=None)
def _tensorcores_per_chip():
    """1 for v2/v3/v5e/v6e (single TC per device), 2 for megacore (v4/v5p/v7x)."""
    try:
        kind = jax.devices()[0].device_kind.lower()
    except Exception:
        return 1
    if any(t in kind for t in ("lite", "v5e", "v6e", "v6", "v2", "v3")):
        return 1
    if any(t in kind for t in ("v4", "v5p", "7")):
        return 2
    return 1


def _pick_row_tile(n_rows, tm, n_cores):
    """Row tile: big (amortize ~0.35us/grid-step), multiple of 8 (or == n_rows),
    and only split a small batch across grid steps when the chip has 2 TCs."""
    tm = max(8, _round_up(int(tm), 8))
    if n_rows <= tm:
        if n_cores >= 2 and n_rows > 16:
            tm_eff = _round_up(pl.cdiv(n_rows, 2), 8)   # feed both TensorCores
        else:
            tm_eff = n_rows                             # one full-height block
    else:
        tm_eff = tm
        if n_cores >= 2:
            steps = pl.cdiv(n_rows, tm_eff)
            if steps % 2:                               # keep step count even
                tm_eff = _round_up(pl.cdiv(n_rows, steps + 1), 8)
    return tm_eff, pl.cdiv(n_rows, tm_eff)


def _vmem_limit(need_bytes, vmem_cap):
    # 2x safety factor, floor 32 MiB, cap at 7/8 of physical VMEM (headroom for
    # compiler scratch): ~56 MiB on v7x, ~112 MiB on v5e/v6e.
    return int(min(max(2 * need_bytes, 32 << 20), (vmem_cap * 7) // 8))


def _resident_spec(shape, index_map, single_buffer):
    """Grid-invariant (weight/bias) block: whole tensor resident every step.
    Constant index_map => double buffering buys nothing, so request a single
    buffer when the installed Pallas supports pipeline_mode."""
    if single_buffer:
        try:
            return pl.BlockSpec(shape, index_map, pipeline_mode=pl.Buffered(1))
        except (TypeError, AttributeError):
            pass
    return pl.BlockSpec(shape, index_map)


# --------------------------------------------------------------------------- #
# Fused 3-layer kernel (all weights resident in VMEM, batch axis tiled)
# --------------------------------------------------------------------------- #
def _mlp_kernel(x_ref, w1_ref, b1_ref, w2_ref, b2_ref, w3_ref, b3_ref, o_ref):
    """relu(relu(relu(x@W1+b1)@W2+b2)@W3+b3).  MXU operands use the weight
    dtype (bf16 weights => bf16 matmul operands); accumulation and the
    elementwise bias+ReLU stay in f32 (v5e has no bf16 VPU datapath)."""
    dot_dtype = w1_ref.dtype

    h = jnp.dot(x_ref[...].astype(dot_dtype), w1_ref[...],
                preferred_element_type=jnp.float32)
    h = jnp.maximum(h + b1_ref[...].astype(jnp.float32), 0.0)

    h = jnp.dot(h.astype(dot_dtype), w2_ref[...],
                preferred_element_type=jnp.float32)
    h = jnp.maximum(h + b2_ref[...].astype(jnp.float32), 0.0)

    h = jnp.dot(h.astype(dot_dtype), w3_ref[...],
                preferred_element_type=jnp.float32)
    h = jnp.maximum(h + b3_ref[...].astype(jnp.float32), 0.0)

    o_ref[...] = h.astype(o_ref.dtype)


def _fused_forward(x, w1, b1, w2, b2, w3, b3, *, tm, vmem_cap, n_cores,
                   single_buffer):
    n_rows, d_in = x.shape
    d_h1, d_h2, d_out = w1.shape[1], w2.shape[1], w3.shape[1]

    tm_eff, grid_m = _pick_row_tile(n_rows, tm, n_cores)

    io, wb, bb = x.dtype.itemsize, w1.dtype.itemsize, b1.dtype.itemsize
    wbuf = 1 if single_buffer else 2
    need = (2 * tm_eff * d_in * io                              # x tiles (dbl-buffered)
            + 2 * tm_eff * d_out * io                           # out tiles
            + wbuf * (d_in * d_h1 + d_h1 * d_h2 + d_h2 * d_out) * wb
            + wbuf * (d_h1 + d_h2 + d_out) * bb
            + 3 * tm_eff * max(d_h1, d_h2, d_out) * 4)          # f32 intermediates

    in_specs = [
        # x: native feature width (block == full last dim -> legal, no padding).
        pl.BlockSpec((tm_eff, d_in), lambda i: (i, 0)),
        _resident_spec((d_in, d_h1), lambda i: (0, 0), single_buffer),
        _resident_spec((1, d_h1), lambda i: (0, 0), single_buffer),
        _resident_spec((d_h1, d_h2), lambda i: (0, 0), single_buffer),
        _resident_spec((1, d_h2), lambda i: (0, 0), single_buffer),
        _resident_spec((d_h2, d_out), lambda i: (0, 0), single_buffer),
        _resident_spec((1, d_out), lambda i: (0, 0), single_buffer),
    ]
    # Narrow (d_out-wide) output block: masked stores, but on this HBM-bound
    # kernel the raw-byte saving (no pad, no slice-back copy) dominates.
    out_spec = pl.BlockSpec((tm_eff, d_out), lambda i: (i, 0))

    # TODO(synk): if profiling still shows exposed DMA, set
    # pipeline_mode=pl.Buffered(3) on the x spec (extra buffers are cheap here).
    return pl.pallas_call(
        _mlp_kernel,
        out_shape=jax.ShapeDtypeStruct((n_rows, d_out), x.dtype),
        grid_spec=pltpu.PrefetchScalarGridSpec(
            num_scalar_prefetch=0,
            grid=(grid_m,),                 # ragged: last block bounds-masked
            in_specs=in_specs,
            out_specs=out_spec,
        ),
        compiler_params=pltpu.CompilerParams(
            dimension_semantics=("parallel",),
            vmem_limit_bytes=_vmem_limit(need, vmem_cap),
        ),
    )(x, w1, b1, w2, b2, w3, b3)


# --------------------------------------------------------------------------- #
# Per-layer fallback (for hidden dims too large to keep all weights resident)
# --------------------------------------------------------------------------- #
def _linear_relu_kernel(x_ref, w_ref, b_ref, o_ref):
    h = jnp.dot(x_ref[...].astype(w_ref.dtype), w_ref[...],
                preferred_element_type=jnp.float32)
    o_ref[...] = jnp.maximum(h + b_ref[...].astype(jnp.float32),
                             0.0).astype(o_ref.dtype)


def _linear_relu(x, w, b, *, tm, vmem_cap, n_cores):
    n_rows, d_in = x.shape
    d_out = w.shape[1]
    tm_eff, grid_m = _pick_row_tile(n_rows, tm, n_cores)
    tn = d_out if d_out <= 512 else 512          # 128-multiple when actually tiled
    grid_n = pl.cdiv(d_out, tn)

    # TODO(synk): add a K-reduction grid axis (f32 VMEM accumulator + pl.when
    # init/finalize, axis "arbitrary") for input feature dims too large to keep
    # a (d_in, tn) weight slab resident in VMEM.
    io, wb = x.dtype.itemsize, w.dtype.itemsize
    need = (2 * tm_eff * d_in * io + 2 * d_in * tn * wb + 2 * tn * b.dtype.itemsize
            + 2 * tm_eff * tn * io + 2 * tm_eff * tn * 4)

    return pl.pallas_call(
        _linear_relu_kernel,
        out_shape=jax.ShapeDtypeStruct((n_rows, d_out), x.dtype),
        grid_spec=pltpu.PrefetchScalarGridSpec(
            num_scalar_prefetch=0,
            grid=(grid_m, grid_n),
            in_specs=[
                pl.BlockSpec((tm_eff, d_in), lambda i, j: (i, 0)),
                pl.BlockSpec((d_in, tn), lambda i, j: (0, j)),
                pl.BlockSpec((1, tn), lambda i, j: (0, j)),
            ],
            out_specs=pl.BlockSpec((tm_eff, tn), lambda i, j: (i, j)),
        ),
        compiler_params=pltpu.CompilerParams(
            dimension_semantics=("parallel", "parallel"),
            vmem_limit_bytes=_vmem_limit(need, vmem_cap),
        ),
    )(x, w, b)


# --------------------------------------------------------------------------- #
# Public entry point
# --------------------------------------------------------------------------- #
@functools.partial(
    jax.jit, static_argnames=("tm", "force_per_layer", "single_buffer_weights"))
def mlp_forward(x, w1, b1, w2, b2, w3, b3, *, tm=1024,
                force_per_layer=False, single_buffer_weights=True):
    """x: (N, input_dim). Weights: (in, out). Biases: (1, out). -> (N, out_dim)."""
    n_rows, d_in = x.shape
    d_h1, d_h2, d_out = w1.shape[1], w2.shape[1], w3.shape[1]

    vmem_cap = _vmem_capacity_bytes()
    n_cores = _tensorcores_per_chip()

    wbuf = 1 if single_buffer_weights else 2
    resident_bytes = wbuf * (
        (d_in * d_h1 + d_h1 * d_h2 + d_h2 * d_out) * w1.dtype.itemsize
        + (d_h1 + d_h2 + d_out) * b1.dtype.itemsize)
    use_fused = (not force_per_layer) and resident_bytes <= vmem_cap // 3

    if use_fused:
        return _fused_forward(x, w1, b1, w2, b2, w3, b3, tm=tm,
                              vmem_cap=vmem_cap, n_cores=n_cores,
                              single_buffer=single_buffer_weights)
    # Weights too large to keep resident (or forced): per-layer kernels, each
    # tiling its output-feature dim so a single huge layer still fits in VMEM.
    h = x
    for w, b in ((w1, b1), (w2, b2), (w3, b3)):
        h = _linear_relu(h, w, b, tm=tm, vmem_cap=vmem_cap, n_cores=n_cores)
    return h


# --------------------------------------------------------------------------- #
# Parameter init (matches the PyTorch module) + pure-JAX reference
# --------------------------------------------------------------------------- #
def init_mlp_params(key, input_dim, output_dim, num_hidden_lyr=2,
                    hidden_channels=None, dtype=jnp.float32):
    """weight: xavier_normal_ with gain=calculate_gain('relu')=sqrt(2)
    bias: PyTorch nn.Linear default U(-1/sqrt(fan_in), 1/sqrt(fan_in)).
    Weights returned pre-transposed as (in_dim, out_dim)."""
    if not hidden_channels:
        hidden_channels = [input_dim for _ in range(num_hidden_lyr)]
    layer_channels = [input_dim] + hidden_channels + [output_dim]

    gain = jnp.sqrt(2.0)
    params = []
    for i in range(len(layer_channels) - 1):
        fan_in, fan_out = layer_channels[i], layer_channels[i + 1]
        key, wk, bk = jax.random.split(key, 3)
        std = gain * jnp.sqrt(2.0 / (fan_in + fan_out))
        w = (std * jax.random.normal(wk, (fan_in, fan_out))).astype(dtype)
        bound = 1.0 / jnp.sqrt(fan_in)
        b = jax.random.uniform(bk, (1, fan_out), minval=-bound,
                               maxval=bound).astype(dtype)
        params.append((w, b))
    return params


def mlp_reference(x, params):
    h = x
    for w, b in params:
        h = jnp.maximum(jnp.dot(h, w) + b, 0.0)
    return h


if __name__ == "__main__":
    key = jax.random.PRNGKey(0)
    k_x, k_p = jax.random.split(key)

    # Small shapes; N deliberately NOT a multiple of 8 to exercise ragged blocks.
    N, input_dim, output_dim = 203, 32, 16
    x = jax.random.normal(k_x, (N, input_dim), dtype=jnp.float32)

    params = init_mlp_params(k_p, input_dim, output_dim,
                             num_hidden_lyr=2, hidden_channels=None)
    (w1, b1), (w2, b2), (w3, b3) = params
    ref = mlp_reference(x, params)

    def run(*args, **kw):
        return jax.block_until_ready(mlp_forward(*args, **kw))

    # Fused f32 path (single-buffered resident weights when supported).
    sbw = True
    try:
        out = run(x, w1, b1, w2, b2, w3, b3, single_buffer_weights=sbw)
    except Exception:
        sbw = False  # older Pallas without pipeline_mode / Buffered(1)
        out = run(x, w1, b1, w2, b2, w3, b3, single_buffer_weights=sbw)
    assert out.shape == (N, output_dim)
    assert jnp.allclose(out, ref, atol=1e-4, rtol=1e-4), "f32 fused mismatch"

    # Small row tile -> multi-step ragged grid (exercises masked last block).
    out_tiled = run(x, w1, b1, w2, b2, w3, b3, tm=64, single_buffer_weights=sbw)
    assert jnp.allclose(out_tiled, ref, atol=1e-4, rtol=1e-4), "ragged-grid mismatch"

    # bf16-on-MXU path (v6e/v7x): weights pre-cast ONCE here (not per call);
    # biases stay f32, accumulation stays f32.
    bf16_params = [(w.astype(jnp.bfloat16), b) for w, b in params]
    (w1b, b1b), (w2b, b2b), (w3b, b3b) = bf16_params
    out_bf16 = run(x.astype(jnp.bfloat16), w1b, b1b, w2b, b2b, w3b, b3b,
                   single_buffer_weights=sbw)
    assert out_bf16.shape == (N, output_dim)
    assert jnp.allclose(out_bf16.astype(jnp.float32), ref, atol=0.15, rtol=0.1), \
        "bf16 fused mismatch"

    # Per-layer fallback path (used automatically when the three weights do not
    # fit resident in VMEM; forced here so it is exercised at small shapes).
    out_pl = run(x, w1, b1, w2, b2, w3, b3, force_per_layer=True,
                 single_buffer_weights=sbw)
    assert jnp.allclose(out_pl, ref, atol=1e-4, rtol=1e-4), "per-layer mismatch"

    print("KERNEL_OK")
</pallas_src>

<mosaic_0001>
module attributes {stable_mosaic.version = 11 : i64} {
  func.func @_mlp_kernel(%arg0: i32, %arg1: memref<203x32xf32, #tpu.memory_space<vmem>>, %arg2: memref<32x32xf32, #tpu.memory_space<vmem>>, %arg3: memref<1x32xf32, #tpu.memory_space<vmem>>, %arg4: memref<32x32xf32, #tpu.memory_space<vmem>>, %arg5: memref<1x32xf32, #tpu.memory_space<vmem>>, %arg6: memref<32x16xf32, #tpu.memory_space<vmem>>, %arg7: memref<1x16xf32, #tpu.memory_space<vmem>>, %arg8: memref<203x16xf32, #tpu.memory_space<vmem>>) attributes {dimension_semantics = [#tpu.dimension_semantics<parallel>], iteration_bounds = array<i64: 1>, scalar_prefetch = 0 : i64, scratch_operands = 0 : i64, tpu.core_type = #tpu.core_type<tc>, window_params = [{transform_indices = @transform_0, window_bounds = array<i64: 203, 32>}, {pipeline_mode = #tpu.pipeline_mode<synchronous>, transform_indices = @transform_1, window_bounds = array<i64: 32, 32>}, {pipeline_mode = #tpu.pipeline_mode<synchronous>, transform_indices = @transform_2, window_bounds = array<i64: 1, 32>}, {pipeline_mode = #tpu.pipeline_mode<synchronous>, transform_indices = @transform_3, window_bounds = array<i64: 32, 32>}, {pipeline_mode = #tpu.pipeline_mode<synchronous>, transform_indices = @transform_4, window_bounds = array<i64: 1, 32>}, {pipeline_mode = #tpu.pipeline_mode<synchronous>, transform_indices = @transform_5, window_bounds = array<i64: 32, 16>}, {pipeline_mode = #tpu.pipeline_mode<synchronous>, transform_indices = @transform_6, window_bounds = array<i64: 1, 16>}, {transform_indices = @transform_7, window_bounds = array<i64: 203, 16>}]} {
    %c0 = arith.constant 0 : index
    %c0_0 = arith.constant 0 : index
    %0 = vector.load %arg1[%c0, %c0_0] : memref<203x32xf32, #tpu.memory_space<vmem>>, vector<203x32xf32>
    %c0_1 = arith.constant 0 : index
    %c0_2 = arith.constant 0 : index
    %1 = vector.load %arg2[%c0_1, %c0_2] : memref<32x32xf32, #tpu.memory_space<vmem>>, vector<32x32xf32>
    %cst = arith.constant dense<0.000000e+00> : vector<203x32xf32>
    %2 = tpu.matmul %0, %1, %cst {dimension_numbers = #tpu.dot_dimension_numbers<[1], [0], [0], [1], [0, 0, 1, 1], [], []>} : vector<203x32xf32>, vector<32x32xf32>, vector<203x32xf32> -> vector<203x32xf32>
    %c0_3 = arith.constant 0 : index
    %c0_4 = arith.constant 0 : index
    %3 = vector.load %arg3[%c0_3, %c0_4] : memref<1x32xf32, #tpu.memory_space<vmem>>, vector<1x32xf32>
    %4 = vector.broadcast %3 : vector<1x32xf32> to vector<203x32xf32>
    %5 = arith.addf %2, %4 : vector<203x32xf32>
    %cst_5 = arith.constant 0.000000e+00 : f32
    %6 = vector.broadcast %cst_5 : f32 to vector<203x32xf32>
    %7 = arith.maximumf %5, %6 : vector<203x32xf32>
    %c0_6 = arith.constant 0 : index
    %c0_7 = arith.constant 0 : index
    %8 = vector.load %arg4[%c0_6, %c0_7] : memref<32x32xf32, #tpu.memory_space<vmem>>, vector<32x32xf32>
    %cst_8 = arith.constant dense<0.000000e+00> : vector<203x32xf32>
    %9 = tpu.matmul %7, %8, %cst_8 {dimension_numbers = #tpu.dot_dimension_numbers<[1], [0], [0], [1], [0, 0, 1, 1], [], []>} : vector<203x32xf32>, vector<32x32xf32>, vector<203x32xf32> -> vector<203x32xf32>
    %c0_9 = arith.constant 0 : index
    %c0_10 = arith.constant 0 : index
    %10 = vector.load %arg5[%c0_9, %c0_10] : memref<1x32xf32, #tpu.memory_space<vmem>>, vector<1x32xf32>
    %11 = vector.broadcast %10 : vector<1x32xf32> to vector<203x32xf32>
    %12 = arith.addf %9, %11 : vector<203x32xf32>
    %cst_11 = arith.constant 0.000000e+00 : f32
    %13 = vector.broadcast %cst_11 : f32 to vector<203x32xf32>
    %14 = arith.maximumf %12, %13 : vector<203x32xf32>
    %c0_12 = arith.constant 0 : index
    %c0_13 = arith.constant 0 : index
    %15 = vector.load %arg6[%c0_12, %c0_13] : memref<32x16xf32, #tpu.memory_space<vmem>>, vector<32x16xf32>
    %cst_14 = arith.constant dense<0.000000e+00> : vector<203x16xf32>
    %16 = tpu.matmul %14, %15, %cst_14 {dimension_numbers = #tpu.dot_dimension_numbers<[1], [0], [0], [1], [0, 0, 1, 1], [], []>} : vector<203x32xf32>, vector<32x16xf32>, vector<203x16xf32> -> vector<203x16xf32>
    %c0_15 = arith.constant 0 : index
    %c0_16 = arith.constant 0 : index
    %17 = vector.load %arg7[%c0_15, %c0_16] : memref<1x16xf32, #tpu.memory_space<vmem>>, vector<1x16xf32>
    %18 = vector.broadcast %17 : vector<1x16xf32> to vector<203x16xf32>
    %19 = arith.addf %16, %18 : vector<203x16xf32>
    %cst_17 = arith.constant 0.000000e+00 : f32
    %20 = vector.broadcast %cst_17 : f32 to vector<203x16xf32>
    %21 = arith.maximumf %19, %20 : vector<203x16xf32>
    %c0_18 = arith.constant 0 : index
    %c0_19 = arith.constant 0 : index
    %22 = vector.load %arg8[%c0_18, %c0_19] : memref<203x16xf32, #tpu.memory_space<vmem>>, vector<203x16xf32>
    tpu.vector_store %arg8[%c0_18, %c0_19], %21 {strides = array<i32>} : memref<203x16xf32, #tpu.memory_space<vmem>>, vector<203x16xf32>,
    return
  }
  func.func @transform_0(%arg0: i32) -> (i32, i32) {
    %c0_i32 = arith.constant 0 : i32
    %c0_i32_0 = arith.constant 0 : i32
    return %arg0, %c0_i32 : i32, i32
  }
  func.func @transform_1(%arg0: i32) -> (i32, i32) {
    %c0_i32 = arith.constant 0 : i32
    %c0_i32_0 = arith.constant 0 : i32
    %c0_i32_1 = arith.constant 0 : i32
    return %c0_i32, %c0_i32_0 : i32, i32
  }
  func.func @transform_2(%arg0: i32) -> (i32, i32) {
    %c0_i32 = arith.constant 0 : i32
    %c0_i32_0 = arith.constant 0 : i32
    %c0_i32_1 = arith.constant 0 : i32
    return %c0_i32, %c0_i32_0 : i32, i32
  }
  func.func @transform_3(%arg0: i32) -> (i32, i32) {
    %c0_i32 = arith.constant 0 : i32
    %c0_i32_0 = arith.constant 0 : i32
    %c0_i32_1 = arith.constant 0 : i32
    return %c0_i32, %c0_i32_0 : i32, i32
  }
  func.func @transform_4(%arg0: i32) -> (i32, i32) {
    %c0_i32 = arith.constant 0 : i32
    %c0_i32_0 = arith.constant 0 : i32
    %c0_i32_1 = arith.constant 0 : i32
    return %c0_i32, %c0_i32_0 : i32, i32
  }
  func.func @transform_5(%arg0: i32) -> (i32, i32) {
    %c0_i32 = arith.constant 0 : i32
    %c0_i32_0 = arith.constant 0 : i32
    %c0_i32_1 = arith.constant 0 : i32
    return %c0_i32, %c0_i32_0 : i32, i32
  }
  func.func @transform_6(%arg0: i32) -> (i32, i32) {
    %c0_i32 = arith.constant 0 : i32
    %c0_i32_0 = arith.constant 0 : i32
    %c0_i32_1 = arith.constant 0 : i32
    return %c0_i32, %c0_i32_0 : i32, i32
  }
  func.func @transform_7(%arg0: i32) -> (i32, i32) {
    %c0_i32 = arith.constant 0 : i32
    %c0_i32_0 = arith.constant 0 : i32
    return %arg0, %c0_i32 : i32, i32
  }
}

module attributes {stable_mosaic.version = 11 : i64} {
  func.func @_mlp_kernel(%arg0: i32, %arg1: memref<203x32xf32, #tpu.memory_space<vmem>>, %arg2: memref<32x32xf32, #tpu.memory_space<vmem>>, %arg3: memref<1x32xf32, #tpu.memory_space<vmem>>, %arg4: memref<32x32xf32, #tpu.memory_space<vmem>>, %arg5: memref<1x32xf32, #tpu.memory_space<vmem>>, %arg6: memref<32x16xf32, #tpu.memory_space<vmem>>, %arg7: memref<1x16xf32, #tpu.memory_space<vmem>>, %arg8: memref<203x16xf32, #tpu.memory_space<vmem>>) attributes {dimension_semantics = [#tpu.dimension_semantics<parallel>], iteration_bounds = array<i64: 1>, scalar_prefetch = 0 : i64, scratch_operands = 0 : i64, tpu.core_type = #tpu.core_type<tc>, window_params = [{transform_indices = @transform_0, window_bounds = array<i64: 203, 32>}, {pipeline_mode = #tpu.pipeline_mode<synchronous>, transform_indices = @transform_1, window_bounds = array<i64: 32, 32>}, {pipeline_mode = #tpu.pipeline_mode<synchronous>, transform_indices = @transform_2, window_bounds = array<i64: 1, 32>}, {pipeline_mode = #tpu.pipeline_mode<synchronous>, transform_indices = @transform_3, window_bounds = array<i64: 32, 32>}, {pipeline_mode = #tpu.pipeline_mode<synchronous>, transform_indices = @transform_4, window_bounds = array<i64: 1, 32>}, {pipeline_mode = #tpu.pipeline_mode<synchronous>, transform_indices = @transform_5, window_bounds = array<i64: 32, 16>}, {pipeline_mode = #tpu.pipeline_mode<synchronous>, transform_indices = @transform_6, window_bounds = array<i64: 1, 16>}, {transform_indices = @transform_7, window_bounds = array<i64: 203, 16>}]} {
    %c0 = arith.constant 0 : index
    %c0_0 = arith.constant 0 : index
    %0 = vector.load %arg1[%c0, %c0_0] : memref<203x32xf32, #tpu.memory_space<vmem>>, vector<203x32xf32>
    %c0_1 = arith.constant 0 : index
    %c0_2 = arith.constant 0 : index
    %1 = vector.load %arg2[%c0_1, %c0_2] : memref<32x32xf32, #tpu.memory_space<vmem>>, vector<32x32xf32>
    %cst = arith.constant dense<0.000000e+00> : vector<203x32xf32>
    %2 = tpu.matmul %0, %1, %cst {dimension_numbers = #tpu.dot_dimension_numbers<[1], [0], [0], [1], [0, 0, 1, 1], [], []>} : vector<203x32xf32>, vector<32x32xf32>, vector<203x32xf32> -> vector<203x32xf32>
    %c0_3 = arith.constant 0 : index
    %c0_4 = arith.constant 0 : index
    %3 = vector.load %arg3[%c0_3, %c0_4] : memref<1x32xf32, #tpu.memory_space<vmem>>, vector<1x32xf32>
    %4 = vector.broadcast %3 : vector<1x32xf32> to vector<203x32xf32>
    %5 = arith.addf %2, %4 : vector<203x32xf32>
    %cst_5 = arith.constant 0.000000e+00 : f32
    %6 = vector.broadcast %cst_5 : f32 to vector<203x32xf32>
    %7 = arith.maximumf %5, %6 : vector<203x32xf32>
    %c0_6 = arith.constant 0 : index
    %c0_7 = arith.constant 0 : index
    %8 = vector.load %arg4[%c0_6, %c0_7] : memref<32x32xf32, #tpu.memory_space<vmem>>, vector<32x32xf32>
    %cst_8 = arith.constant dense<0.000000e+00> : vector<203x32xf32>
    %9 = tpu.matmul %7, %8, %cst_8 {dimension_numbers = #tpu.dot_dimension_numbers<[1], [0], [0], [1], [0, 0, 1, 1], [], []>} : vector<203x32xf32>, vector<32x32xf32>, vector<203x32xf32> -> vector<203x32xf32>
    %c0_9 = arith.constant 0 : index
    %c0_10 = arith.constant 0 : index
    %10 = vector.load %arg5[%c0_9, %c0_10] : memref<1x32xf32, #tpu.memory_space<vmem>>, vector<1x32xf32>
    %11 = vector.broadcast %10 : vector<1x32xf32> to vector<203x32xf32>
    %12 = arith.addf %9, %11 : vector<203x32xf32>
    %cst_11 = arith.constant 0.000000e+00 : f32
    %13 = vector.broadcast %cst_11 : f32 to vector<203x32xf32>
    %14 = arith.maximumf %12, %13 : vector<203x32xf32>
    %c0_12 = arith.constant 0 : index
    %c0_13 = arith.constant 0 : index
    %15 = vector.load %arg6[%c0_12, %c0_13] : memref<32x16xf32, #tpu.memory_space<vmem>>, vector<32x16xf32>
    %cst_14 = arith.constant dense<0.000000e+00> : vector<203x16xf32>
    %16 = tpu.matmul %14, %15, %cst_14 {dimension_numbers = #tpu.dot_dimension_numbers<[1], [0], [0], [1], [0, 0, 1, 1], [], []>} : vector<203x32xf32>, vector<32x16xf32>, vector<203x16xf32> -> vector<203x16xf32>
    %c0_15 = arith.constant 0 : index
    %c0_16 = arith.constant 0 : index
    %17 = vector.load %arg7[%c0_15, %c0_16] : memref<1x16xf32, #tpu.memory_space<vmem>>, vector<1x16xf32>
    %18 = vector.broadcast %17 : vector<1x16xf32> to vector<203x16xf32>
    %19 = arith.addf %16, %18 : vector<203x16xf32>
    %cst_17 = arith.constant 0.000000e+00 : f32
    %20 = vector.broadcast %cst_17 : f32 to vector<203x16xf32>
    %21 = arith.maximumf %19, %20 : vector<203x16xf32>
    %c0_18 = arith.constant 0 : index
    %c0_19 = arith.constant 0 : index
    %22 = vector.load %arg8[%c0_18, %c0_19] : memref<203x16xf32, #tpu.memory_space<vmem>>, vector<203x16xf32>
    tpu.vector_store %arg8[%c0_18, %c0_19], %21 {strides = array<i32>} : memref<203x16xf32, #tpu.memory_space<vmem>>, vector<203x16xf32>,
    return
  }
  func.func @transform_0(%arg0: i32) -> (i32, i32) {
    %c0_i32 = arith.constant 0 : i32
    %c0_i32_0 = arith.constant 0 : i32
    return %arg0, %c0_i32 : i32, i32
  }
  func.func @transform_1(%arg0: i32) -> (i32, i32) {
    %c0_i32 = arith.constant 0 : i32
    %c0_i32_0 = arith.constant 0 : i32
    %c0_i32_1 = arith.constant 0 : i32
    return %c0_i32, %c0_i32_0 : i32, i32
  }
  func.func @transform_2(%arg0: i32) -> (i32, i32) {
    %c0_i32 = arith.constant 0 : i32
    %c0_i32_0 = arith.constant 0 : i32
    %c0_i32_1 = arith.constant 0 : i32
    return %c0_i32, %c0_i32_0 : i32, i32
  }
  func.func @transform_3(%arg0: i32) -> (i32, i32) {
    %c0_i32 = arith.constant 0 : i32
    %c0_i32_0 = arith.constant 0 : i32
    %c0_i32_1 = arith.constant 0 : i32
    return %c0_i32, %c0_i32_0 : i32, i32
  }
  func.func @transform_4(%arg0: i32) -> (i32, i32) {
    %c0_i32 = arith.constant 0 : i32
    %c0_i32_0 = arith.constant 0 : i32
    %c0_i32_1 = arith.constant 0 : i32
    return %c0_i32, %c0_i32_0 : i32, i32
  }
  func.func @transform_5(%arg0: i32) -> (i32, i32) {
    %c0_i32 = arith.constant 0 : i32
    %c0_i32_0 = arith.constant 0 : i32
    %c0_i32_1 = arith.constant 0 : i32
    return %c0_i32, %c0_i32_0 : i32, i32
  }
  func.func @transform_6(%arg0: i32) -> (i32, i32) {
    %c0_i32 = arith.constant 0 : i32
    %c0_i32_0 = arith.constant 0 : i32
    %c0_i32_1 = arith.constant 0 : i32
    return %c0_i32, %c0_i32_0 : i32, i32
  }
  func.func @transform_7(%arg0: i32) -> (i32, i32) {
    %c0_i32 = arith.constant 0 : i32
    %c0_i32_0 = arith.constant 0 : i32
    return %arg0, %c0_i32 : i32, i32
  }
}

</mosaic_0001>

<bundles_post_ra>
// kernel: mlp_forward.1
= control target key start
LH: loop header
LB: loop body
LE: loop exit
PB: predicated region body
PF: predicated region fallthrough
CT: control target
= control target key end

     0   :  { %vm63_vm0 = vcmask 261120   ;;  %vm983_vm1 = vcmask 130048   ;;  %vm1009_vm2 = vcmask 124928   ;;  %s1763_s1 = inlined_call_operand.vmem [shape: f32[32,32], index: 1, kind: input, shape index: {}]   ;;  %s1764_s0 = inlined_call_operand.vmem [shape: f32[203,32], index: 0, kind: input, shape index: {}]   ;;  %s1765_s3 = inlined_call_operand.vmem [shape: f32[32,32], index: 3, kind: input, shape index: {}]   ;;  %s1766_s5 = inlined_call_operand.vmem [shape: f32[32,16], index: 5, kind: input, shape index: {}]   ;;  %s1767_s2 = inlined_call_operand.vmem [shape: f32[1,32], index: 2, kind: input, shape index: {}]   ;;  %s1768_s4 = inlined_call_operand.vmem [shape: f32[1,32], index: 4, kind: input, shape index: {}]   ;;  %s1769_s6 = inlined_call_operand.vmem [shape: f32[1,16], index: 6, kind: input, shape index: {}]   ;;  %s1770_s7 = inlined_call_operand.vmem [shape: f32[203,16], index: 7, kind: output, shape index: {}]  }
   0x1   :  { %v55_v0 = vld [vmem:[%s1763_s1 + $0x18] sm:$0xff]  ;;  %v54_v1 = vld [vmem:[%s1763_s1 + $0x10] sm:$0xff]  ;;  %v26_v2 = vld [vmem:[%s1764_s0] sm:$0xff] }
   0x2   :  { %1186 = vmatprep.subr.mxu0 %v55_v0  ;;  %1327 = vmatprep.subr.mxu1 %v55_v0  ;;  %v53_v3 = vld [vmem:[%s1763_s1 + $0x8] sm:$0xff]  ;;  %v52_v4 = vld [vmem:[%s1763_s1] sm:$0xff]  ;;  %v28_v6 = vld [vmem:[%s1764_s0 + $0x10] sm:$0xff] }
   0x3   :  { %1187 = vmatpush3.msra.mxu0 %v55_v0  ;;  %1194 = vmatprep.mubr.msk.f32.mxu0 %vm63_vm0, %v26_v2  ;;  %v27_v5 = vld [vmem:[%s1764_s0 + $0x8] sm:$0xff]  ;;  %v40_v7 = vld [vmem:[%s1764_s0 + $0x70] sm:$0xff]  ;;  %v41_v8 = vld [vmem:[%s1764_s0 + $0x78] sm:$0xff] }
   0x4   :  { %1188 = vmatprep.subr.mxu0 %v54_v1  ;;  %1331 = vmatpush3.msra.mxu1 %v55_v0  ;;  %v42_v9 = vld [vmem:[%s1764_s0 + $0x80] sm:$0xff]  ;;  %v29_v10 = vld [vmem:[%s1764_s0 + $0x18] sm:$0xff]  ;;  %v365_v12 = vld [vmem:[%s1765_s3 + $0x10] sm:$0xff] }
   0x5   :  { %1189 = vmatpush3.msra.mxu0 %v54_v1  ;;  %1328 = vmatprep.subr.mxu1 %v54_v1  ;;  %v366_v11 = vld [vmem:[%s1765_s3 + $0x18] sm:$0xff]  ;;  %v30_v13 = vld [vmem:[%s1764_s0 + $0x20] sm:$0xff]  ;;  %v43_v14 = vld [vmem:[%s1764_s0 + $0x88] sm:$0xff] }
   0x6   :  { %1190 = vmatprep.subr.mxu0 %v53_v3  ;;  %1332 = vmatpush3.msra.mxu1 %v54_v1  ;;  %v364_v15 = vld [vmem:[%s1765_s3 + $0x8] sm:$0xff]  ;;  %v44_v16 = vld [vmem:[%s1764_s0 + $0x90] sm:$0xff]  ;;  %v45_v19 = vld [vmem:[%s1764_s0 + $0x98] sm:$0xff] }
   0x7   :  { %1191 = vmatpush3.msra.mxu0 %v53_v3  ;;  %1329 = vmatprep.subr.mxu1 %v53_v3  ;;  %v31_v17 = vld [vmem:[%s1764_s0 + $0x28] sm:$0xff]  ;;  %v32_v18 = vld [vmem:[%s1764_s0 + $0x30] sm:$0xff]  ;;  %v46_v20 = vld [vmem:[%s1764_s0 + $0xa0] sm:$0xff] }
   0x8   :  { %1192 = vmatprep.subr.mxu0 %v52_v4  ;;  %1333 = vmatpush3.msra.mxu1 %v53_v3  ;;  %v33_v21 = vld [vmem:[%s1764_s0 + $0x38] sm:$0xff]  ;;  %v34_v22 = vld [vmem:[%s1764_s0 + $0x40] sm:$0xff]  ;;  %v47_v23 = vld [vmem:[%s1764_s0 + $0xa8] sm:$0xff] }
   0x9   :  { %1193 = vmatpush3.msra.mxu0 %v52_v4  ;;  %1330 = vmatprep.subr.mxu1 %v52_v4  ;;  %v48_v24 = vld [vmem:[%s1764_s0 + $0xb0] sm:$0xff]  ;;  %v35_v25 = vld [vmem:[%s1764_s0 + $0x48] sm:$0xff]  ;;  %v49_v27 = vld [vmem:[%s1764_s0 + $0xb8] sm:$0xff] }
   0xa   :  { %1195 = vmatmul.mubr.msk.f32.vlgmr.msra.gmra.mxu0 %vm63_vm0, %v27_v5  ;;  %1334 = vmatpush3.msra.mxu1 %v52_v4  ;;  %v36_v26 = vld [vmem:[%s1764_s0 + $0x50] sm:$0xff]  ;;  %v50_v28 = vld [vmem:[%s1764_s0 + $0xc0] sm:$0xff]  ;;  %v37_v29 = vld [vmem:[%s1764_s0 + $0x58] sm:$0xff] }
   0xb   :  { %1197 = vmatprep.mubr.msk.f32.mxu0 %vm63_vm0, %v28_v6  ;;  %1215 = vmatprep.mubr.msk.f32.mxu1 %vm63_vm0, %v40_v7  ;;  %v38_v30 = vld [vmem:[%s1764_s0 + $0x60] sm:$0xff]  ;;  %v51_v31 = vld [vmem:[%s1764_s0 + $0xc8] sm:$0x7]  ;;  %v676_v34 = vld [vmem:[%s1766_s5 + $0x18] sm:$0xff] }
   0xc   :  { %1216 = vmatmul.mubr.msk.f32.vlgmr.msra.gmra.mxu1 %vm63_vm0, %v41_v8  ;;  %1233 = vmatprep.subr.mxu1 %v366_v11  ;;  %v39_v32 = vld [vmem:[%s1764_s0 + $0x68] sm:$0xff]  ;;  %v363_v33 = vld [vmem:[%s1765_s3] sm:$0xff]  ;;  %v675_v35 = vld [vmem:[%s1766_s5 + $0x10] sm:$0xff] }
   0xd   :  { %1218 = vmatprep.mubr.msk.f32.mxu1 %vm63_vm0, %v42_v9  ;;  %1234 = vmatpush3.msra.mxu1 %v366_v11  ;;  %v674_v36 = vld [vmem:[%s1766_s5 + $0x8] sm:$0xff]  ;;  %v1515_v37 = vld [vmem:[%s1767_s2] ss:$0 sm:$0xff] }
   0xe   :  { %1198 = vmatmul.mubr.msk.f32.gmra.mxu0 %vm63_vm0, %v29_v10  ;;  %1235 = vmatprep.subr.mxu1 %v365_v12 }
   0xf   :  { %1200 = vmatprep.mubr.msk.f32.mxu0 %vm63_vm0, %v30_v13  ;;  %1236 = vmatpush3.msra.mxu1 %v365_v12 }
  0x10   :  { %1219 = vmatmul.mubr.msk.f32.gmra.mxu1 %vm63_vm0, %v43_v14  ;;  %1237 = vmatprep.subr.mxu1 %v364_v15 }
  0x11   :  { %1221 = vmatprep.mubr.msk.f32.mxu1 %vm63_vm0, %v44_v16  ;;  %1238 = vmatpush3.msra.mxu1 %v364_v15 }
  0x12   :  { %1201 = vmatmul.mubr.msk.f32.gmra.mxu0 %vm63_vm0, %v31_v17  ;;  %1239 = vmatprep.subr.mxu1 %v363_v33 }
  0x13   :  { %1203 = vmatprep.mubr.msk.f32.mxu0 %vm63_vm0, %v32_v18  ;;  %1240 = vmatpush3.msra.mxu1 %v363_v33 }
  0x14   :  { %1222 = vmatmul.mubr.msk.f32.gmra.mxu1 %vm63_vm0, %v45_v19  ;;  %1280 = vmatprep.subr.mxu0 %v676_v34 }
  0x15   :  { %1224 = vmatprep.mubr.msk.f32.mxu1 %vm63_vm0, %v46_v20  ;;  %1281 = vmatpush3.msra.mxu0 %v676_v34 }
  0x16   :  { %1204 = vmatmul.mubr.msk.f32.gmra.mxu0 %vm63_vm0, %v33_v21  ;;  %1282 = vmatprep.subr.mxu0 %v675_v35 }
  0x17   :  { %1206 = vmatprep.mubr.msk.f32.mxu0 %vm63_vm0, %v34_v22  ;;  %1283 = vmatpush3.msra.mxu0 %v675_v35 }
  0x18   :  { %1225 = vmatmul.mubr.msk.f32.gmra.mxu1 %vm63_vm0, %v47_v23  ;;  %1284 = vmatprep.subr.mxu0 %v674_v36 }
  0x19   :  { %1227 = vmatprep.mubr.msk.f32.mxu1 %vm63_vm0, %v48_v24  ;;  %1285 = vmatpush3.msra.mxu0 %v674_v36 }
  0x1a   :  { %1207 = vmatmul.mubr.msk.f32.gmra.mxu0 %vm63_vm0, %v35_v25 }
  0x1b   :  { %1209 = vmatprep.mubr.msk.f32.mxu0 %vm63_vm0, %v36_v26 }
  0x1c   :  { %1228 = vmatmul.mubr.msk.f32.gmra.mxu1 %vm63_vm0, %v49_v27 }
  0x1d   :  { %1230 = vmatprep.mubr.msk.f32.mxu1 %vm63_vm0, %v50_v28 }
  0x1e   :  { %1210 = vmatmul.mubr.msk.f32.gmra.mxu0 %vm63_vm0, %v37_v29 }
  0x1f   :  { %1212 = vmatprep.mubr.msk.f32.mxu0 %vm63_vm0, %v38_v30 }
  0x20   :  { %1231 = vmatmul.mubr.msk.f32.gmra.mxu1 %vm63_vm0, %v51_v31 }
  0x22   :  { %1213 = vmatmul.mubr.msk.f32.gmra.mxu0 %vm63_vm0, %v39_v32 }
  0xca   :  { %v1196_v38 = vpop.f32.mrf.mxu0 }
  0xcb   :  { %v214_v39 = vadd.f32 %v1196_v38, %v1515_v37 }
  0xcc   :  { %v208_v40 = vpop.f32.mrf.mxu0  ;;  %v1217_v41 = vpop.f32.mrf.mxu1 }
  0xcd   :  { %v209_v42 = vadd.f32 %v1515_v37, %v208_v40  ;;  %v338_v46 = vmax.f32 %v214_v39, 0.0  ;;  %v284_v27 = vadd.f32 %v1217_v41, %v1515_v37 }
  0xce   :  { %v1199_v43 = vpop.f32.mrf.mxu0  ;;  %v278_v44 = vpop.f32.mrf.mxu1 }
  0xcf   :  { %v337_v45 = vmax.f32 %v209_v42, 0.0  ;;  %v224_v47 = vadd.f32 %v1199_v43, %v1515_v37  ;;  %v279_v17 = vadd.f32 %v1515_v37, %v278_v44  ;;  %v352_v31 = vmax.f32 %v284_v27, 0.0 }
  0xd0   :  { %v218_v48 = vpop.f32.mrf.mxu0  ;;  %v1220_v49 = vpop.f32.mrf.mxu1 }
  0xd1   :  { %v219_v50 = vadd.f32 %v1515_v37, %v218_v48  ;;  %1241 = vmatprep.mubr.msk.f32.mxu1 %vm63_vm0, %v337_v45  ;;  %v340_v53 = vmax.f32 %v224_v47, 0.0  ;;  %v351_v24 = vmax.f32 %v279_v17, 0.0  ;;  %v294_v32 = vadd.f32 %v1220_v49, %v1515_v37 }
  0xd2   :  { %v1202_v51 = vpop.f32.mrf.mxu0  ;;  %1242 = vmatmul.mubr.msk.f32.vlgmr.msra.gmra.mxu1 %vm63_vm0, %v338_v46  ;;  %v288_v56 = vpop.f32.mrf.mxu1 }
  0xd3   :  { %v339_v52 = vmax.f32 %v219_v50, 0.0  ;;  %v234_v54 = vadd.f32 %v1202_v51, %v1515_v37  ;;  %v289_v25 = vadd.f32 %v1515_v37, %v288_v56  ;;  %v354_v36 = vmax.f32 %v294_v32, 0.0 }
  0xd4   :  { %v228_v55 = vpop.f32.mrf.mxu0  ;;  %v1223_v63 = vpop.f32.mrf.mxu1 }
  0xd5   :  { %v229_v57 = vadd.f32 %v1515_v37, %v228_v55  ;;  %1244 = vmatprep.mubr.msk.f32.mxu1 %vm63_vm0, %v339_v52  ;;  %v342_v60 = vmax.f32 %v234_v54, 0.0  ;;  %v353_v29 = vmax.f32 %v289_v25, 0.0  ;;  %v304_v38 = vadd.f32 %v1223_v63, %v1515_v37  ;;  %v1575_v54 = vld [vmem:[%s1768_s4] ss:$0 sm:$0xff] }
  0xd6   :  { %v1205_v58 = vpop.f32.mrf.mxu0  ;;  %1245 = vmatmul.mubr.msk.f32.gmra.mxu1 %vm63_vm0, %v340_v53  ;;  %v298_v6 = vpop.f32.mrf.mxu1  ;;  %v673_v53 = vld [vmem:[%s1766_s5] sm:$0xff] }
  0xd7   :  { %v341_v59 = vmax.f32 %v229_v57, 0.0  ;;  %v244_v61 = vadd.f32 %v1205_v58, %v1515_v37  ;;  %v299_v30 = vadd.f32 %v1515_v37, %v298_v6  ;;  %v356_v42 = vmax.f32 %v304_v38, 0.0  ;;  %1286 = vmatprep.subr.mxu0 %v673_v53 }
  0xd8   :  { %v238_v62 = vpop.f32.mrf.mxu0  ;;  %v1226_v13 = vpop.f32.mrf.mxu1  ;;  %1287 = vmatpush3.msra.mxu0 %v673_v53 }
  0xd9   :  { %v239_v0 = vadd.f32 %v1515_v37, %v238_v62  ;;  %1247 = vmatprep.mubr.msk.f32.mxu1 %vm63_vm0, %v341_v59  ;;  %v344_v3 = vmax.f32 %v244_v61, 0.0  ;;  %v355_v34 = vmax.f32 %v299_v30, 0.0  ;;  %v314_v43 = vadd.f32 %v1226_v13, %v1515_v37 }
  0xda   :  { %v1208_v1 = vpop.f32.mrf.mxu0  ;;  %1248 = vmatmul.mubr.msk.f32.gmra.mxu1 %vm63_vm0, %v342_v60  ;;  %v308_v21 = vpop.f32.mrf.mxu1 }
  0xdb   :  { %v343_v2 = vmax.f32 %v239_v0, 0.0  ;;  %v254_v4 = vadd.f32 %v1208_v1, %v1515_v37  ;;  %v309_v35 = vadd.f32 %v1515_v37, %v308_v21  ;;  %v358_v47 = vmax.f32 %v314_v43, 0.0 }
  0xdc   :  { %v248_v5 = vpop.f32.mrf.mxu0  ;;  %v1229_v28 = vpop.f32.mrf.mxu1 }
  0xdd   :  { %v249_v7 = vadd.f32 %v1515_v37, %v248_v5  ;;  %1250 = vmatprep.mubr.msk.f32.mxu1 %vm63_vm0, %v343_v2  ;;  %v346_v10 = vmax.f32 %v254_v4, 0.0  ;;  %v357_v40 = vmax.f32 %v309_v35, 0.0  ;;  %v324_v48 = vadd.f32 %v1229_v28, %v1515_v37 }
  0xde   :  { %v1211_v8 = vpop.f32.mrf.mxu0  ;;  %1251 = vmatmul.mubr.msk.f32.gmra.mxu1 %vm63_vm0, %v344_v3  ;;  %v318_v33 = vpop.f32.mrf.mxu1 }
  0xdf   :  { %v345_v9 = vmax.f32 %v249_v7, 0.0  ;;  %v264_v11 = vadd.f32 %v1211_v8, %v1515_v37  ;;  %v319_v41 = vadd.f32 %v1515_v37, %v318_v33  ;;  %v360_v50 = vmax.f32 %v324_v48, 0.0 }
  0xe0   :  { %v258_v12 = vpop.f32.mrf.mxu0  ;;  %v1232_v39 = vpop.f32.mrf.mxu1 }
  0xe1   :  { %v259_v14 = vadd.f32 %v1515_v37, %v258_v12  ;;  %1253 = vmatprep.mubr.msk.f32.mxu1 %vm63_vm0, %v345_v9  ;;  %v348_v18 = vmax.f32 %v264_v11, 0.0  ;;  %v359_v45 = vmax.f32 %v319_v41, 0.0  ;;  %v334_v51 = vadd.f32 %v1232_v39, %v1515_v37 }
  0xe2   :  { %v1214_v15 = vpop.f32.mrf.mxu0  ;;  %1254 = vmatmul.mubr.msk.f32.gmra.mxu1 %vm63_vm0, %v346_v10  ;;  %v328_v44 = vpop.f32.mrf.mxu1 }
  0xe3   :  { %v347_v16 = vmax.f32 %v259_v14, 0.0  ;;  %v274_v19 = vadd.f32 %v1214_v15, %v1515_v37  ;;  %v329_v46 = vadd.f32 %v1515_v37, %v328_v44  ;;  %v362_v52 = vmax.f32 %v334_v51, 0.0 }
  0xe4   :  { %v268_v20 = vpop.f32.mrf.mxu0 }
  0xe5   :  { %v269_v22 = vadd.f32 %v1515_v37, %v268_v20  ;;  %1256 = vmatprep.mubr.msk.f32.mxu1 %vm63_vm0, %v347_v16  ;;  %v350_v26 = vmax.f32 %v274_v19, 0.0  ;;  %v361_v49 = vmax.f32 %v329_v46, 0.0 }
  0xe6   :  { %1257 = vmatmul.mubr.msk.f32.gmra.mxu1 %vm63_vm0, %v348_v18 }
  0xe7   :  { %v349_v23 = vmax.f32 %v269_v22, 0.0 }
  0xe9   :  { %1259 = vmatprep.mubr.msk.f32.mxu1 %vm63_vm0, %v349_v23 }
  0xea   :  { %1260 = vmatmul.mubr.msk.f32.gmra.mxu1 %vm63_vm0, %v350_v26 }
  0xeb   :  { %1262 = vmatprep.mubr.msk.f32.mxu1 %vm63_vm0, %v351_v24 }
  0xee   :  { %1263 = vmatmul.mubr.msk.f32.gmra.mxu1 %vm63_vm0, %v352_v31 }
  0xef   :  { %1265 = vmatprep.mubr.msk.f32.mxu1 %vm63_vm0, %v353_v29 }
  0xf2   :  { %1266 = vmatmul.mubr.msk.f32.gmra.mxu1 %vm63_vm0, %v354_v36 }
  0xf3   :  { %1268 = vmatprep.mubr.msk.f32.mxu1 %vm63_vm0, %v355_v34 }
  0xf6   :  { %1269 = vmatmul.mubr.msk.f32.gmra.mxu1 %vm63_vm0, %v356_v42 }
  0xf7   :  { %1271 = vmatprep.mubr.msk.f32.mxu1 %vm63_vm0, %v357_v40 }
  0xfa   :  { %1272 = vmatmul.mubr.msk.f32.gmra.mxu1 %vm63_vm0, %v358_v47 }
  0xfb   :  { %1274 = vmatprep.mubr.msk.f32.mxu1 %vm63_vm0, %v359_v45 }
  0xfe   :  { %1275 = vmatmul.mubr.msk.f32.gmra.mxu1 %vm63_vm0, %v360_v50 }
  0xff   :  { %1277 = vmatprep.mubr.msk.f32.mxu1 %vm63_vm0, %v361_v49 }
 0x102   :  { %1278 = vmatmul.mubr.msk.f32.gmra.mxu1 %vm63_vm0, %v362_v52 }
 0x192   :  { %v1243_v55 = vpop.f32.mrf.mxu1 }
 0x193   :  { %v524_v37 = vadd.f32 %v1243_v55, %v1575_v54 }
 0x194   :  { %v518_v56 = vpop.f32.mrf.mxu1 }
 0x195   :  { %v519_v57 = vadd.f32 %v1575_v54, %v518_v56  ;;  %v648_v60 = vmax.f32 %v524_v37, 0.0 }
 0x196   :  { %v1246_v58 = vpop.f32.mrf.mxu1 }
 0x197   :  { %v647_v59 = vmax.f32 %v519_v57, 0.0  ;;  %v534_v61 = vadd.f32 %v1246_v58, %v1575_v54 }
 0x198   :  { %v528_v62 = vpop.f32.mrf.mxu1 }
 0x199   :  { %v529_v63 = vadd.f32 %v1575_v54, %v528_v62  ;;  %1288 = vmatprep.mubr.msk.f32.mxu0 %vm63_vm0, %v647_v59  ;;  %v650_v2 = vmax.f32 %v534_v61, 0.0 }
 0x19a   :  { %v1249_v0 = vpop.f32.mrf.mxu1  ;;  %1289 = vmatmul.mubr.msk.f32.vlgmr.msra.gmra.mxu0 %vm63_vm0, %v648_v60 }
 0x19b   :  { %v649_v1 = vmax.f32 %v529_v63, 0.0  ;;  %v544_v3 = vadd.f32 %v1249_v0, %v1575_v54 }
 0x19c   :  { %v538_v4 = vpop.f32.mrf.mxu1 }
 0x19d   :  { %v539_v5 = vadd.f32 %v1575_v54, %v538_v4  ;;  %1291 = vmatprep.mubr.msk.f32.mxu0 %vm63_vm0, %v649_v1  ;;  %v652_v8 = vmax.f32 %v544_v3, 0.0 }
 0x19e   :  { %v1252_v6 = vpop.f32.mrf.mxu1  ;;  %1292 = vmatmul.mubr.msk.f32.gmra.mxu0 %vm63_vm0, %v650_v2 }
 0x19f   :  { %v651_v7 = vmax.f32 %v539_v5, 0.0  ;;  %v554_v9 = vadd.f32 %v1252_v6, %v1575_v54  ;;  %v1632_v5 = vld [vmem:[%s1769_s6] ss:$0 sm:$0xff] }
 0x1a0   :  { %v548_v10 = vpop.f32.mrf.mxu1 }
 0x1a1   :  { %v549_v11 = vadd.f32 %v1575_v54, %v548_v10  ;;  %1294 = vmatprep.mubr.msk.f32.mxu0 %vm63_vm0, %v651_v7  ;;  %v654_v14 = vmax.f32 %v554_v9, 0.0 }
 0x1a2   :  { %v1255_v12 = vpop.f32.mrf.mxu1  ;;  %1295 = vmatmul.mubr.msk.f32.gmra.mxu0 %vm63_vm0, %v652_v8 }
 0x1a3   :  { %v653_v13 = vmax.f32 %v549_v11, 0.0  ;;  %v564_v15 = vadd.f32 %v1255_v12, %v1575_v54 }
 0x1a4   :  { %v558_v16 = vpop.f32.mrf.mxu1 }
 0x1a5   :  { %v559_v17 = vadd.f32 %v1575_v54, %v558_v16  ;;  %1297 = vmatprep.mubr.msk.f32.mxu0 %vm63_vm0, %v653_v13  ;;  %v656_v20 = vmax.f32 %v564_v15, 0.0 }
 0x1a6   :  { %v1258_v18 = vpop.f32.mrf.mxu1  ;;  %1298 = vmatmul.mubr.msk.f32.gmra.mxu0 %vm63_vm0, %v654_v14 }
 0x1a7   :  { %v655_v19 = vmax.f32 %v559_v17, 0.0  ;;  %v574_v21 = vadd.f32 %v1258_v18, %v1575_v54 }
 0x1a8   :  { %v568_v22 = vpop.f32.mrf.mxu1 }
 0x1a9   :  { %v569_v23 = vadd.f32 %v1575_v54, %v568_v22  ;;  %1300 = vmatprep.mubr.msk.f32.mxu0 %vm63_vm0, %v655_v19  ;;  %v658_v26 = vmax.f32 %v574_v21, 0.0 }
 0x1aa   :  { %v1261_v24 = vpop.f32.mrf.mxu1  ;;  %1301 = vmatmul.mubr.msk.f32.gmra.mxu0 %vm63_vm0, %v656_v20 }
 0x1ab   :  { %v657_v25 = vmax.f32 %v569_v23, 0.0  ;;  %v584_v27 = vadd.f32 %v1261_v24, %v1575_v54 }
 0x1ac   :  { %v578_v28 = vpop.f32.mrf.mxu1 }
 0x1ad   :  { %v579_v29 = vadd.f32 %v1575_v54, %v578_v28  ;;  %1303 = vmatprep.mubr.msk.f32.mxu0 %vm63_vm0, %v657_v25  ;;  %v660_v32 = vmax.f32 %v584_v27, 0.0 }
 0x1ae   :  { %v1264_v30 = vpop.f32.mrf.mxu1  ;;  %1304 = vmatmul.mubr.msk.f32.gmra.mxu0 %vm63_vm0, %v658_v26 }
 0x1af   :  { %v659_v31 = vmax.f32 %v579_v29, 0.0  ;;  %v594_v33 = vadd.f32 %v1264_v30, %v1575_v54 }
 0x1b0   :  { %v588_v34 = vpop.f32.mrf.mxu1 }
 0x1b1   :  { %v589_v35 = vadd.f32 %v1575_v54, %v588_v34  ;;  %1306 = vmatprep.mubr.msk.f32.mxu0 %vm63_vm0, %v659_v31  ;;  %v662_v39 = vmax.f32 %v594_v33, 0.0 }
 0x1b2   :  { %v1267_v36 = vpop.f32.mrf.mxu1  ;;  %1307 = vmatmul.mubr.msk.f32.gmra.mxu0 %vm63_vm0, %v660_v32 }
 0x1b3   :  { %v661_v38 = vmax.f32 %v589_v35, 0.0  ;;  %v604_v40 = vadd.f32 %v1267_v36, %v1575_v54 }
 0x1b4   :  { %v598_v41 = vpop.f32.mrf.mxu1 }
 0x1b5   :  { %v599_v42 = vadd.f32 %v1575_v54, %v598_v41  ;;  %1309 = vmatprep.mubr.msk.f32.mxu0 %vm63_vm0, %v661_v38  ;;  %v664_v45 = vmax.f32 %v604_v40, 0.0 }
 0x1b6   :  { %v1270_v43 = vpop.f32.mrf.mxu1  ;;  %1310 = vmatmul.mubr.msk.f32.gmra.mxu0 %vm63_vm0, %v662_v39 }
 0x1b7   :  { %v663_v44 = vmax.f32 %v599_v42, 0.0  ;;  %v614_v46 = vadd.f32 %v1270_v43, %v1575_v54 }
 0x1b8   :  { %v608_v47 = vpop.f32.mrf.mxu1 }
 0x1b9   :  { %v609_v48 = vadd.f32 %v1575_v54, %v608_v47  ;;  %1312 = vmatprep.mubr.msk.f32.mxu0 %vm63_vm0, %v663_v44  ;;  %v666_v51 = vmax.f32 %v614_v46, 0.0 }
 0x1ba   :  { %v1273_v49 = vpop.f32.mrf.mxu1  ;;  %1313 = vmatmul.mubr.msk.f32.gmra.mxu0 %vm63_vm0, %v664_v45 }
 0x1bb   :  { %v665_v50 = vmax.f32 %v609_v48, 0.0  ;;  %v624_v52 = vadd.f32 %v1273_v49, %v1575_v54 }
 0x1bc   :  { %v618_v53 = vpop.f32.mrf.mxu1 }
 0x1bd   :  { %v619_v55 = vadd.f32 %v1575_v54, %v618_v53  ;;  %1315 = vmatprep.mubr.msk.f32.mxu0 %vm63_vm0, %v665_v50  ;;  %v668_v57 = vmax.f32 %v624_v52, 0.0 }
 0x1be   :  { %v1276_v37 = vpop.f32.mrf.mxu1  ;;  %1316 = vmatmul.mubr.msk.f32.gmra.mxu0 %vm63_vm0, %v666_v51 }
 0x1bf   :  { %v667_v56 = vmax.f32 %v619_v55, 0.0  ;;  %v634_v58 = vadd.f32 %v1276_v37, %v1575_v54 }
 0x1c0   :  { %v628_v59 = vpop.f32.mrf.mxu1 }
 0x1c1   :  { %v629_v60 = vadd.f32 %v1575_v54, %v628_v59  ;;  %1318 = vmatprep.mubr.msk.f32.mxu0 %vm63_vm0, %v667_v56  ;;  %v670_v63 = vmax.f32 %v634_v58, 0.0 }
 0x1c2   :  { %v1279_v61 = vpop.f32.mrf.mxu1  ;;  %1319 = vmatmul.mubr.msk.f32.gmra.mxu0 %vm63_vm0, %v668_v57 }
 0x1c3   :  { %v669_v62 = vmax.f32 %v629_v60, 0.0  ;;  %v644_v0 = vadd.f32 %v1279_v61, %v1575_v54 }
 0x1c4   :  { %v638_v1 = vpop.f32.mrf.mxu1 }
 0x1c5   :  { %v639_v2 = vadd.f32 %v1575_v54, %v638_v1  ;;  %1321 = vmatprep.mubr.msk.f32.mxu0 %vm63_vm0, %v669_v62  ;;  %v672_v4 = vmax.f32 %v644_v0, 0.0 }
 0x1c6   :  { %1322 = vmatmul.mubr.msk.f32.gmra.mxu0 %vm63_vm0, %v670_v63 }
 0x1c7   :  { %v671_v3 = vmax.f32 %v639_v2, 0.0 }
 0x1c9   :  { %1324 = vmatprep.mubr.msk.f32.mxu0 %vm63_vm0, %v671_v3 }
 0x1ca   :  { %1325 = vmatmul.mubr.msk.f32.gmra.mxu0 %vm63_vm0, %v672_v4 }
 0x25a   :  { %v1290_v6 = vpop.f32.mrf.mxu0 }
 0x25b   :  { %v834_v7 = vadd.f32 %v1290_v6, %v1632_v5 }
 0x25c   :  { %v828_v54 = vpop.f32.mrf.mxu0 }
 0x25d   :  { %v958_v8 = vmax.f32 %v834_v7, 0.0  ;;  %v829_v9 = vadd.f32 %v1632_v5, %v828_v54 }
 0x25e   :  { %v1293_v10 = vpop.f32.mrf.mxu0 }
 0x25f   :  { %985 = vst.msk [vmem:[%s1770_s7 + $0x8] sm:$0xff] %vm983_vm1, %v958_v8  ;;  %v957_v11 = vmax.f32 %v829_v9, 0.0  ;;  %v844_v12 = vadd.f32 %v1293_v10, %v1632_v5 }
 0x260   :  { %v838_v13 = vpop.f32.mrf.mxu0 }
 0x261   :  { %984 = vst.msk [vmem:[%s1770_s7] sm:$0xff] %vm983_vm1, %v957_v11  ;;  %v960_v14 = vmax.f32 %v844_v12, 0.0  ;;  %v839_v15 = vadd.f32 %v1632_v5, %v838_v13 }
 0x262   :  { %v1296_v16 = vpop.f32.mrf.mxu0 }
 0x263   :  { %987 = vst.msk [vmem:[%s1770_s7 + $0x18] sm:$0xff] %vm983_vm1, %v960_v14  ;;  %v959_v17 = vmax.f32 %v839_v15, 0.0  ;;  %v854_v18 = vadd.f32 %v1296_v16, %v1632_v5 }
 0x264   :  { %v848_v19 = vpop.f32.mrf.mxu0 }
 0x265   :  { %986 = vst.msk [vmem:[%s1770_s7 + $0x10] sm:$0xff] %vm983_vm1, %v959_v17  ;;  %v962_v20 = vmax.f32 %v854_v18, 0.0  ;;  %v849_v21 = vadd.f32 %v1632_v5, %v848_v19 }
 0x266   :  { %v1299_v22 = vpop.f32.mrf.mxu0 }
 0x267   :  { %989 = vst.msk [vmem:[%s1770_s7 + $0x28] sm:$0xff] %vm983_vm1, %v962_v20  ;;  %v961_v23 = vmax.f32 %v849_v21, 0.0  ;;  %v864_v24 = vadd.f32 %v1299_v22, %v1632_v5 }
 0x268   :  { %v858_v25 = vpop.f32.mrf.mxu0 }
 0x269   :  { %988 = vst.msk [vmem:[%s1770_s7 + $0x20] sm:$0xff] %vm983_vm1, %v961_v23  ;;  %v964_v26 = vmax.f32 %v864_v24, 0.0  ;;  %v859_v27 = vadd.f32 %v1632_v5, %v858_v25 }
 0x26a   :  { %v1302_v28 = vpop.f32.mrf.mxu0 }
 0x26b   :  { %991 = vst.msk [vmem:[%s1770_s7 + $0x38] sm:$0xff] %vm983_vm1, %v964_v26  ;;  %v963_v29 = vmax.f32 %v859_v27, 0.0  ;;  %v874_v30 = vadd.f32 %v1302_v28, %v1632_v5 }
 0x26c   :  { %v868_v31 = vpop.f32.mrf.mxu0 }
 0x26d   :  { %990 = vst.msk [vmem:[%s1770_s7 + $0x30] sm:$0xff] %vm983_vm1, %v963_v29  ;;  %v966_v32 = vmax.f32 %v874_v30, 0.0  ;;  %v869_v33 = vadd.f32 %v1632_v5, %v868_v31 }
 0x26e   :  { %v1305_v34 = vpop.f32.mrf.mxu0 }
 0x26f   :  { %993 = vst.msk [vmem:[%s1770_s7 + $0x48] sm:$0xff] %vm983_vm1, %v966_v32  ;;  %v965_v35 = vmax.f32 %v869_v33, 0.0  ;;  %v884_v36 = vadd.f32 %v1305_v34, %v1632_v5 }
 0x270   :  { %v878_v38 = vpop.f32.mrf.mxu0 }
 0x271   :  { %992 = vst.msk [vmem:[%s1770_s7 + $0x40] sm:$0xff] %vm983_vm1, %v965_v35  ;;  %v968_v39 = vmax.f32 %v884_v36, 0.0  ;;  %v879_v40 = vadd.f32 %v1632_v5, %v878_v38 }
 0x272   :  { %v1308_v41 = vpop.f32.mrf.mxu0 }
 0x273   :  { %995 = vst.msk [vmem:[%s1770_s7 + $0x58] sm:$0xff] %vm983_vm1, %v968_v39  ;;  %v967_v42 = vmax.f32 %v879_v40, 0.0  ;;  %v894_v43 = vadd.f32 %v1308_v41, %v1632_v5 }
 0x274   :  { %v888_v44 = vpop.f32.mrf.mxu0 }
 0x275   :  { %994 = vst.msk [vmem:[%s1770_s7 + $0x50] sm:$0xff] %vm983_vm1, %v967_v42  ;;  %v970_v45 = vmax.f32 %v894_v43, 0.0  ;;  %v889_v46 = vadd.f32 %v1632_v5, %v888_v44 }
 0x276   :  { %v1311_v47 = vpop.f32.mrf.mxu0 }
 0x277   :  { %997 = vst.msk [vmem:[%s1770_s7 + $0x68] sm:$0xff] %vm983_vm1, %v970_v45  ;;  %v969_v48 = vmax.f32 %v889_v46, 0.0  ;;  %v904_v49 = vadd.f32 %v1311_v47, %v1632_v5 }
 0x278   :  { %v898_v50 = vpop.f32.mrf.mxu0 }
 0x279   :  { %996 = vst.msk [vmem:[%s1770_s7 + $0x60] sm:$0xff] %vm983_vm1, %v969_v48  ;;  %v972_v51 = vmax.f32 %v904_v49, 0.0  ;;  %v899_v52 = vadd.f32 %v1632_v5, %v898_v50 }
 0x27a   :  { %v1314_v53 = vpop.f32.mrf.mxu0 }
 0x27b   :  { %999 = vst.msk [vmem:[%s1770_s7 + $0x78] sm:$0xff] %vm983_vm1, %v972_v51  ;;  %v971_v55 = vmax.f32 %v899_v52, 0.0  ;;  %v914_v37 = vadd.f32 %v1314_v53, %v1632_v5 }
 0x27c   :  { %v908_v56 = vpop.f32.mrf.mxu0 }
 0x27d   :  { %998 = vst.msk [vmem:[%s1770_s7 + $0x70] sm:$0xff] %vm983_vm1, %v971_v55  ;;  %v974_v57 = vmax.f32 %v914_v37, 0.0  ;;  %v909_v58 = vadd.f32 %v1632_v5, %v908_v56 }
 0x27e   :  { %v1317_v59 = vpop.f32.mrf.mxu0 }
 0x27f   :  { %1001 = vst.msk [vmem:[%s1770_s7 + $0x88] sm:$0xff] %vm983_vm1, %v974_v57  ;;  %v973_v60 = vmax.f32 %v909_v58, 0.0  ;;  %v924_v61 = vadd.f32 %v1317_v59, %v1632_v5 }
 0x280   :  { %v918_v62 = vpop.f32.mrf.mxu0 }
 0x281   :  { %1000 = vst.msk [vmem:[%s1770_s7 + $0x80] sm:$0xff] %vm983_vm1, %v973_v60  ;;  %v976_v63 = vmax.f32 %v924_v61, 0.0  ;;  %v919_v0 = vadd.f32 %v1632_v5, %v918_v62 }
 0x282   :  { %v1320_v1 = vpop.f32.mrf.mxu0 }
 0x283   :  { %1003 = vst.msk [vmem:[%s1770_s7 + $0x98] sm:$0xff] %vm983_vm1, %v976_v63  ;;  %v975_v2 = vmax.f32 %v919_v0, 0.0  ;;  %v934_v3 = vadd.f32 %v1320_v1, %v1632_v5 }
 0x284   :  { %v928_v4 = vpop.f32.mrf.mxu0 }
 0x285   :  { %1002 = vst.msk [vmem:[%s1770_s7 + $0x90] sm:$0xff] %vm983_vm1, %v975_v2  ;;  %v978_v6 = vmax.f32 %v934_v3, 0.0  ;;  %v929_v7 = vadd.f32 %v1632_v5, %v928_v4 }
 0x286   :  { %v1323_v54 = vpop.f32.mrf.mxu0 }
 0x287   :  { %1005 = vst.msk [vmem:[%s1770_s7 + $0xa8] sm:$0xff] %vm983_vm1, %v978_v6  ;;  %v977_v8 = vmax.f32 %v929_v7, 0.0  ;;  %v944_v9 = vadd.f32 %v1323_v54, %v1632_v5 }
 0x288   :  { %v938_v10 = vpop.f32.mrf.mxu0 }
 0x289   :  { %1004 = vst.msk [vmem:[%s1770_s7 + $0xa0] sm:$0xff] %vm983_vm1, %v977_v8  ;;  %v980_v11 = vmax.f32 %v944_v9, 0.0  ;;  %v939_v12 = vadd.f32 %v1632_v5, %v938_v10 }
 0x28a   :  { %v1326_v13 = vpop.f32.mrf.mxu0 }
 0x28b   :  { %1007 = vst.msk [vmem:[%s1770_s7 + $0xb8] sm:$0xff] %vm983_vm1, %v980_v11  ;;  %v979_v14 = vmax.f32 %v939_v12, 0.0  ;;  %v954_v15 = vadd.f32 %v1326_v13, %v1632_v5 }
 0x28c   :  { %v948_v16 = vpop.f32.mrf.mxu0 }
 0x28d   :  { %1006 = vst.msk [vmem:[%s1770_s7 + $0xb0] sm:$0xff] %vm983_vm1, %v979_v14  ;;  %v982_v17 = vmax.f32 %v954_v15, 0.0  ;;  %v949_v18 = vadd.f32 %v1632_v5, %v948_v16 }
 0x28f   :  { %1010 = vst.msk [vmem:[%s1770_s7 + $0xc8] sm:$0x7] %vm1009_vm2, %v982_v17  ;;  %v981_v19 = vmax.f32 %v949_v18, 0.0 }
 0x291   :  { %1008 = vst.msk [vmem:[%s1770_s7 + $0xc0] sm:$0xff] %vm983_vm1, %v981_v19 }

// kernel: mlp_forward.1
= control target key start
LH: loop header
LB: loop body
LE: loop exit
PB: predicated region body
PF: predicated region fallthrough
CT: control target
= control target key end

     0   :  { %vm63_vm0 = vcmask 261120   ;;  %vm983_vm1 = vcmask 130048   ;;  %vm1009_vm2 = vcmask 124928   ;;  %s1763_s1 = inlined_call_operand.vmem [shape: f32[32,32], index: 1, kind: input, shape index: {}]   ;;  %s1764_s0 = inlined_call_operand.vmem [shape: f32[203,32], index: 0, kind: input, shape index: {}]   ;;  %s1765_s3 = inlined_call_operand.vmem [shape: f32[32,32], index: 3, kind: input, shape index: {}]   ;;  %s1766_s5 = inlined_call_operand.vmem [shape: f32[32,16], index: 5, kind: input, shape index: {}]   ;;  %s1767_s2 = inlined_call_operand.vmem [shape: f32[1,32], index: 2, kind: input, shape index: {}]   ;;  %s1768_s4 = inlined_call_operand.vmem [shape: f32[1,32], index: 4, kind: input, shape index: {}]   ;;  %s1769_s6 = inlined_call_operand.vmem [shape: f32[1,16], index: 6, kind: input, shape index: {}]   ;;  %s1770_s7 = inlined_call_operand.vmem [shape: f32[203,16], index: 7, kind: output, shape index: {}]  }
   0x1   :  { %v55_v0 = vld [vmem:[%s1763_s1 + $0x18] sm:$0xff]  ;;  %v54_v1 = vld [vmem:[%s1763_s1 + $0x10] sm:$0xff]  ;;  %v26_v2 = vld [vmem:[%s1764_s0] sm:$0xff] }
   0x2   :  { %1186 = vmatprep.subr.mxu0 %v55_v0  ;;  %1327 = vmatprep.subr.mxu1 %v55_v0  ;;  %v53_v3 = vld [vmem:[%s1763_s1 + $0x8] sm:$0xff]  ;;  %v52_v4 = vld [vmem:[%s1763_s1] sm:$0xff]  ;;  %v28_v6 = vld [vmem:[%s1764_s0 + $0x10] sm:$0xff] }
   0x3   :  { %1187 = vmatpush3.msra.mxu0 %v55_v0  ;;  %1194 = vmatprep.mubr.msk.f32.mxu0 %vm63_vm0, %v26_v2  ;;  %v27_v5 = vld [vmem:[%s1764_s0 + $0x8] sm:$0xff]  ;;  %v40_v7 = vld [vmem:[%s1764_s0 + $0x70] sm:$0xff]  ;;  %v41_v8 = vld [vmem:[%s1764_s0 + $0x78] sm:$0xff] }
   0x4   :  { %1188 = vmatprep.subr.mxu0 %v54_v1  ;;  %1331 = vmatpush3.msra.mxu1 %v55_v0  ;;  %v42_v9 = vld [vmem:[%s1764_s0 + $0x80] sm:$0xff]  ;;  %v29_v10 = vld [vmem:[%s1764_s0 + $0x18] sm:$0xff]  ;;  %v365_v12 = vld [vmem:[%s1765_s3 + $0x10] sm:$0xff] }
   0x5   :  { %1189 = vmatpush3.msra.mxu0 %v54_v1  ;;  %1328 = vmatprep.subr.mxu1 %v54_v1  ;;  %v366_v11 = vld [vmem:[%s1765_s3 + $0x18] sm:$0xff]  ;;  %v30_v13 = vld [vmem:[%s1764_s0 + $0x20] sm:$0xff]  ;;  %v43_v14 = vld [vmem:[%s1764_s0 + $0x88] sm:$0xff] }
   0x6   :  { %1190 = vmatprep.subr.mxu0 %v53_v3  ;;  %1332 = vmatpush3.msra.mxu1 %v54_v1  ;;  %v364_v15 = vld [vmem:[%s1765_s3 + $0x8] sm:$0xff]  ;;  %v44_v16 = vld [vmem:[%s1764_s0 + $0x90] sm:$0xff]  ;;  %v45_v19 = vld [vmem:[%s1764_s0 + $0x98] sm:$0xff] }
   0x7   :  { %1191 = vmatpush3.msra.mxu0 %v53_v3  ;;  %1329 = vmatprep.subr.mxu1 %v53_v3  ;;  %v31_v17 = vld [vmem:[%s1764_s0 + $0x28] sm:$0xff]  ;;  %v32_v18 = vld [vmem:[%s1764_s0 + $0x30] sm:$0xff]  ;;  %v46_v20 = vld [vmem:[%s1764_s0 + $0xa0] sm:$0xff] }
   0x8   :  { %1192 = vmatprep.subr.mxu0 %v52_v4  ;;  %1333 = vmatpush3.msra.mxu1 %v53_v3  ;;  %v33_v21 = vld [vmem:[%s1764_s0 + $0x38] sm:$0xff]  ;;  %v34_v22 = vld [vmem:[%s1764_s0 + $0x40] sm:$0xff]  ;;  %v47_v23 = vld [vmem:[%s1764_s0 + $0xa8] sm:$0xff] }
   0x9   :  { %1193 = vmatpush3.msra.mxu0 %v52_v4  ;;  %1330 = vmatprep.subr.mxu1 %v52_v4  ;;  %v48_v24 = vld [vmem:[%s1764_s0 + $0xb0] sm:$0xff]  ;;  %v35_v25 = vld [vmem:[%s1764_s0 + $0x48] sm:$0xff]  ;;  %v49_v27 = vld [vmem:[%s1764_s0 + $0xb8] sm:$0xff] }
   0xa   :  { %1195 = vmatmul.mubr.msk.f32.vlgmr.msra.gmra.mxu0 %vm63_vm0, %v27_v5  ;;  %1334 = vmatpush3.msra.mxu1 %v52_v4  ;;  %v36_v26 = vld [vmem:[%s1764_s0 + $0x50] sm:$0xff]  ;;  %v50_v28 = vld [vmem:[%s1764_s0 + $0xc0] sm:$0xff]  ;;  %v37_v29 = vld [vmem:[%s1764_s0 + $0x58] sm:$0xff] }
   0xb   :  { %1197 = vmatprep.mubr.msk.f32.mxu0 %vm63_vm0, %v28_v6  ;;  %1215 = vmatprep.mubr.msk.f32.mxu1 %vm63_vm0, %v40_v7  ;;  %v38_v30 = vld [vmem:[%s1764_s0 + $0x60] sm:$0xff]  ;;  %v51_v31 = vld [vmem:[%s1764_s0 + $0xc8] sm:$0x7]  ;;  %v676_v34 = vld [vmem:[%s1766_s5 + $0x18] sm:$0xff] }
   0xc   :  { %1216 = vmatmul.mubr.msk.f32.vlgmr.msra.gmra.mxu1 %vm63_vm0, %v41_v8  ;;  %1233 = vmatprep.subr.mxu1 %v366_v11  ;;  %v39_v32 = vld [vmem:[%s1764_s0 + $0x68] sm:$0xff]  ;;  %v363_v33 = vld [vmem:[%s1765_s3] sm:$0xff]  ;;  %v675_v35 = vld [vmem:[%s1766_s5 + $0x10] sm:$0xff] }
   0xd   :  { %1218 = vmatprep.mubr.msk.f32.mxu1 %vm63_vm0, %v42_v9  ;;  %1234 = vmatpush3.msra.mxu1 %v366_v11  ;;  %v674_v36 = vld [vmem:[%s1766_s5 + $0x8] sm:$0xff]  ;;  %v1515_v37 = vld [vmem:[%s1767_s2] ss:$0 sm:$0xff] }
   0xe   :  { %1198 = vmatmul.mubr.msk.f32.gmra.mxu0 %vm63_vm0, %v29_v10  ;;  %1235 = vmatprep.subr.mxu1 %v365_v12 }
   0xf   :  { %1200 = vmatprep.mubr.msk.f32.mxu0 %vm63_vm0, %v30_v13  ;;  %1236 = vmatpush3.msra.mxu1 %v365_v12 }
  0x10   :  { %1219 = vmatmul.mubr.msk.f32.gmra.mxu1 %vm63_vm0, %v43_v14  ;;  %1237 = vmatprep.subr.mxu1 %v364_v15 }
  0x11   :  { %1221 = vmatprep.mubr.msk.f32.mxu1 %vm63_vm0, %v44_v16  ;;  %1238 = vmatpush3.msra.mxu1 %v364_v15 }
  0x12   :  { %1201 = vmatmul.mubr.msk.f32.gmra.mxu0 %vm63_vm0, %v31_v17  ;;  %1239 = vmatprep.subr.mxu1 %v363_v33 }
  0x13   :  { %1203 = vmatprep.mubr.msk.f32.mxu0 %vm63_vm0, %v32_v18  ;;  %1240 = vmatpush3.msra.mxu1 %v363_v33 }
  0x14   :  { %1222 = vmatmul.mubr.msk.f32.gmra.mxu1 %vm63_vm0, %v45_v19  ;;  %1280 = vmatprep.subr.mxu0 %v676_v34 }
  0x15   :  { %1224 = vmatprep.mubr.msk.f32.mxu1 %vm63_vm0, %v46_v20  ;;  %1281 = vmatpush3.msra.mxu0 %v676_v34 }
  0x16   :  { %1204 = vmatmul.mubr.msk.f32.gmra.mxu0 %vm63_vm0, %v33_v21  ;;  %1282 = vmatprep.subr.mxu0 %v675_v35 }
  0x17   :  { %1206 = vmatprep.mubr.msk.f32.mxu0 %vm63_vm0, %v34_v22  ;;  %1283 = vmatpush3.msra.mxu0 %v675_v35 }
  0x18   :  { %1225 = vmatmul.mubr.msk.f32.gmra.mxu1 %vm63_vm0, %v47_v23  ;;  %1284 = vmatprep.subr.mxu0 %v674_v36 }
  0x19   :  { %1227 = vmatprep.mubr.msk.f32.mxu1 %vm63_vm0, %v48_v24  ;;  %1285 = vmatpush3.msra.mxu0 %v674_v36 }
  0x1a   :  { %1207 = vmatmul.mubr.msk.f32.gmra.mxu0 %vm63_vm0, %v35_v25 }
  0x1b   :  { %1209 = vmatprep.mubr.msk.f32.mxu0 %vm63_vm0, %v36_v26 }
  0x1c   :  { %1228 = vmatmul.mubr.msk.f32.gmra.mxu1 %vm63_vm0, %v49_v27 }
  0x1d   :  { %1230 = vmatprep.mubr.msk.f32.mxu1 %vm63_vm0, %v50_v28 }
  0x1e   :  { %1210 = vmatmul.mubr.msk.f32.gmra.mxu0 %vm63_vm0, %v37_v29 }
  0x1f   :  { %1212 = vmatprep.mubr.msk.f32.mxu0 %vm63_vm0, %v38_v30 }
  0x20   :  { %1231 = vmatmul.mubr.msk.f32.gmra.mxu1 %vm63_vm0, %v51_v31 }
  0x22   :  { %1213 = vmatmul.mubr.msk.f32.gmra.mxu0 %vm63_vm0, %v39_v32 }
  0xca   :  { %v1196_v38 = vpop.f32.mrf.mxu0 }
  0xcb   :  { %v214_v39 = vadd.f32 %v1196_v38, %v1515_v37 }
  0xcc   :  { %v208_v40 = vpop.f32.mrf.mxu0  ;;  %v1217_v41 = vpop.f32.mrf.mxu1 }
  0xcd   :  { %v209_v42 = vadd.f32 %v1515_v37, %v208_v40  ;;  %v338_v46 = vmax.f32 %v214_v39, 0.0  ;;  %v284_v27 = vadd.f32 %v1217_v41, %v1515_v37 }
  0xce   :  { %v1199_v43 = vpop.f32.mrf.mxu0  ;;  %v278_v44 = vpop.f32.mrf.mxu1 }
  0xcf   :  { %v337_v45 = vmax.f32 %v209_v42, 0.0  ;;  %v224_v47 = vadd.f32 %v1199_v43, %v1515_v37  ;;  %v279_v17 = vadd.f32 %v1515_v37, %v278_v44  ;;  %v352_v31 = vmax.f32 %v284_v27, 0.0 }
  0xd0   :  { %v218_v48 = vpop.f32.mrf.mxu0  ;;  %v1220_v49 = vpop.f32.mrf.mxu1 }
  0xd1   :  { %v219_v50 = vadd.f32 %v1515_v37, %v218_v48  ;;  %1241 = vmatprep.mubr.msk.f32.mxu1 %vm63_vm0, %v337_v45  ;;  %v340_v53 = vmax.f32 %v224_v47, 0.0  ;;  %v351_v24 = vmax.f32 %v279_v17, 0.0  ;;  %v294_v32 = vadd.f32 %v1220_v49, %v1515_v37 }
  0xd2   :  { %v1202_v51 = vpop.f32.mrf.mxu0  ;;  %1242 = vmatmul.mubr.msk.f32.vlgmr.msra.gmra.mxu1 %vm63_vm0, %v338_v46  ;;  %v288_v56 = vpop.f32.mrf.mxu1 }
  0xd3   :  { %v339_v52 = vmax.f32 %v219_v50, 0.0  ;;  %v234_v54 = vadd.f32 %v1202_v51, %v1515_v37  ;;  %v289_v25 = vadd.f32 %v1515_v37, %v288_v56  ;;  %v354_v36 = vmax.f32 %v294_v32, 0.0 }
  0xd4   :  { %v228_v55 = vpop.f32.mrf.mxu0  ;;  %v1223_v63 = vpop.f32.mrf.mxu1 }
  0xd5   :  { %v229_v57 = vadd.f32 %v1515_v37, %v228_v55  ;;  %1244 = vmatprep.mubr.msk.f32.mxu1 %vm63_vm0, %v339_v52  ;;  %v342_v60 = vmax.f32 %v234_v54, 0.0  ;;  %v353_v29 = vmax.f32 %v289_v25, 0.0  ;;  %v304_v38 = vadd.f32 %v1223_v63, %v1515_v37  ;;  %v1575_v54 = vld [vmem:[%s1768_s4] ss:$0 sm:$0xff] }
  0xd6   :  { %v1205_v58 = vpop.f32.mrf.mxu0  ;;  %1245 = vmatmul.mubr.msk.f32.gmra.mxu1 %vm63_vm0, %v340_v53  ;;  %v298_v6 = vpop.f32.mrf.mxu1  ;;  %v673_v53 = vld [vmem:[%s1766_s5] sm:$0xff] }
  0xd7   :  { %v341_v59 = vmax.f32 %v229_v57, 0.0  ;;  %v244_v61 = vadd.f32 %v1205_v58, %v1515_v37  ;;  %v299_v30 = vadd.f32 %v1515_v37, %v298_v6  ;;  %v356_v42 = vmax.f32 %v304_v38, 0.0  ;;  %1286 = vmatprep.subr.mxu0 %v673_v53 }
  0xd8   :  { %v238_v62 = vpop.f32.mrf.mxu0  ;;  %v1226_v13 = vpop.f32.mrf.mxu1  ;;  %1287 = vmatpush3.msra.mxu0 %v673_v53 }
  0xd9   :  { %v239_v0 = vadd.f32 %v1515_v37, %v238_v62  ;;  %1247 = vmatprep.mubr.msk.f32.mxu1 %vm63_vm0, %v341_v59  ;;  %v344_v3 = vmax.f32 %v244_v61, 0.0  ;;  %v355_v34 = vmax.f32 %v299_v30, 0.0  ;;  %v314_v43 = vadd.f32 %v1226_v13, %v1515_v37 }
  0xda   :  { %v1208_v1 = vpop.f32.mrf.mxu0  ;;  %1248 = vmatmul.mubr.msk.f32.gmra.mxu1 %vm63_vm0, %v342_v60  ;;  %v308_v21 = vpop.f32.mrf.mxu1 }
  0xdb   :  { %v343_v2 = vmax.f32 %v239_v0, 0.0  ;;  %v254_v4 = vadd.f32 %v1208_v1, %v1515_v37  ;;  %v309_v35 = vadd.f32 %v1515_v37, %v308_v21  ;;  %v358_v47 = vmax.f32 %v314_v43, 0.0 }
  0xdc   :  { %v248_v5 = vpop.f32.mrf.mxu0  ;;  %v1229_v28 = vpop.f32.mrf.mxu1 }
  0xdd   :  { %v249_v7 = vadd.f32 %v1515_v37, %v248_v5  ;;  %1250 = vmatprep.mubr.msk.f32.mxu1 %vm63_vm0, %v343_v2  ;;  %v346_v10 = vmax.f32 %v254_v4, 0.0  ;;  %v357_v40 = vmax.f32 %v309_v35, 0.0  ;;  %v324_v48 = vadd.f32 %v1229_v28, %v1515_v37 }
  0xde   :  { %v1211_v8 = vpop.f32.mrf.mxu0  ;;  %1251 = vmatmul.mubr.msk.f32.gmra.mxu1 %vm63_vm0, %v344_v3  ;;  %v318_v33 = vpop.f32.mrf.mxu1 }
  0xdf   :  { %v345_v9 = vmax.f32 %v249_v7, 0.0  ;;  %v264_v11 = vadd.f32 %v1211_v8, %v1515_v37  ;;  %v319_v41 = vadd.f32 %v1515_v37, %v318_v33  ;;  %v360_v50 = vmax.f32 %v324_v48, 0.0 }
  0xe0   :  { %v258_v12 = vpop.f32.mrf.mxu0  ;;  %v1232_v39 = vpop.f32.mrf.mxu1 }
  0xe1   :  { %v259_v14 = vadd.f32 %v1515_v37, %v258_v12  ;;  %1253 = vmatprep.mubr.msk.f32.mxu1 %vm63_vm0, %v345_v9  ;;  %v348_v18 = vmax.f32 %v264_v11, 0.0  ;;  %v359_v45 = vmax.f32 %v319_v41, 0.0  ;;  %v334_v51 = vadd.f32 %v1232_v39, %v1515_v37 }
  0xe2   :  { %v1214_v15 = vpop.f32.mrf.mxu0  ;;  %1254 = vmatmul.mubr.msk.f32.gmra.mxu1 %vm63_vm0, %v346_v10  ;;  %v328_v44 = vpop.f32.mrf.mxu1 }
  0xe3   :  { %v347_v16 = vmax.f32 %v259_v14, 0.0  ;;  %v274_v19 = vadd.f32 %v1214_v15, %v1515_v37  ;;  %v329_v46 = vadd.f32 %v1515_v37, %v328_v44  ;;  %v362_v52 = vmax.f32 %v334_v51, 0.0 }
  0xe4   :  { %v268_v20 = vpop.f32.mrf.mxu0 }
  0xe5   :  { %v269_v22 = vadd.f32 %v1515_v37, %v268_v20  ;;  %1256 = vmatprep.mubr.msk.f32.mxu1 %vm63_vm0, %v347_v16  ;;  %v350_v26 = vmax.f32 %v274_v19, 0.0  ;;  %v361_v49 = vmax.f32 %v329_v46, 0.0 }
  0xe6   :  { %1257 = vmatmul.mubr.msk.f32.gmra.mxu1 %vm63_vm0, %v348_v18 }
  0xe7   :  { %v349_v23 = vmax.f32 %v269_v22, 0.0 }
  0xe9   :  { %1259 = vmatprep.mubr.msk.f32.mxu1 %vm63_vm0, %v349_v23 }
  0xea   :  { %1260 = vmatmul.mubr.msk.f32.gmra.mxu1 %vm63_vm0, %v350_v26 }
  0xeb   :  { %1262 = vmatprep.mubr.msk.f32.mxu1 %vm63_vm0, %v351_v24 }
  0xee   :  { %1263 = vmatmul.mubr.msk.f32.gmra.mxu1 %vm63_vm0, %v352_v31 }
  0xef   :  { %1265 = vmatprep.mubr.msk.f32.mxu1 %vm63_vm0, %v353_v29 }
  0xf2   :  { %1266 = vmatmul.mubr.msk.f32.gmra.mxu1 %vm63_vm0, %v354_v36 }
  0xf3   :  { %1268 = vmatprep.mubr.msk.f32.mxu1 %vm63_vm0, %v355_v34 }
  0xf6   :  { %1269 = vmatmul.mubr.msk.f32.gmra.mxu1 %vm63_vm0, %v356_v42 }
  0xf7   :  { %1271 = vmatprep.mubr.msk.f32.mxu1 %vm63_vm0, %v357_v40 }
  0xfa   :  { %1272 = vmatmul.mubr.msk.f32.gmra.mxu1 %vm63_vm0, %v358_v47 }
  0xfb   :  { %1274 = vmatprep.mubr.msk.f32.mxu1 %vm63_vm0, %v359_v45 }
  0xfe   :  { %1275 = vmatmul.mubr.msk.f32.gmra.mxu1 %vm63_vm0, %v360_v50 }
  0xff   :  { %1277 = vmatprep.mubr.msk.f32.mxu1 %vm63_vm0, %v361_v49 }
 0x102   :  { %1278 = vmatmul.mubr.msk.f32.gmra.mxu1 %vm63_vm0, %v362_v52 }
 0x192   :  { %v1243_v55 = vpop.f32.mrf.mxu1 }
 0x193   :  { %v524_v37 = vadd.f32 %v1243_v55, %v1575_v54 }
 0x194   :  { %v518_v56 = vpop.f32.mrf.mxu1 }
 0x195   :  { %v519_v57 = vadd.f32 %v1575_v54, %v518_v56  ;;  %v648_v60 = vmax.f32 %v524_v37, 0.0 }
 0x196   :  { %v1246_v58 = vpop.f32.mrf.mxu1 }
 0x197   :  { %v647_v59 = vmax.f32 %v519_v57, 0.0  ;;  %v534_v61 = vadd.f32 %v1246_v58, %v1575_v54 }
 0x198   :  { %v528_v62 = vpop.f32.mrf.mxu1 }
 0x199   :  { %v529_v63 = vadd.f32 %v1575_v54, %v528_v62  ;;  %1288 = vmatprep.mubr.msk.f32.mxu0 %vm63_vm0, %v647_v59  ;;  %v650_v2 = vmax.f32 %v534_v61, 0.0 }
 0x19a   :  { %v1249_v0 = vpop.f32.mrf.mxu1  ;;  %1289 = vmatmul.mubr.msk.f32.vlgmr.msra.gmra.mxu0 %vm63_vm0, %v648_v60 }
 0x19b   :  { %v649_v1 = vmax.f32 %v529_v63, 0.0  ;;  %v544_v3 = vadd.f32 %v1249_v0, %v1575_v54 }
 0x19c   :  { %v538_v4 = vpop.f32.mrf.mxu1 }
 0x19d   :  { %v539_v5 = vadd.f32 %v1575_v54, %v538_v4  ;;  %1291 = vmatprep.mubr.msk.f32.mxu0 %vm63_vm0, %v649_v1  ;;  %v652_v8 = vmax.f32 %v544_v3, 0.0 }
 0x19e   :  { %v1252_v6 = vpop.f32.mrf.mxu1  ;;  %1292 = vmatmul.mubr.msk.f32.gmra.mxu0 %vm63_vm0, %v650_v2 }
 0x19f   :  { %v651_v7 = vmax.f32 %v539_v5, 0.0  ;;  %v554_v9 = vadd.f32 %v1252_v6, %v1575_v54  ;;  %v1632_v5 = vld [vmem:[%s1769_s6] ss:$0 sm:$0xff] }
 0x1a0   :  { %v548_v10 = vpop.f32.mrf.mxu1 }
 0x1a1   :  { %v549_v11 = vadd.f32 %v1575_v54, %v548_v10  ;;  %1294 = vmatprep.mubr.msk.f32.mxu0 %vm63_vm0, %v651_v7  ;;  %v654_v14 = vmax.f32 %v554_v9, 0.0 }
 0x1a2   :  { %v1255_v12 = vpop.f32.mrf.mxu1  ;;  %1295 = vmatmul.mubr.msk.f32.gmra.mxu0 %vm63_vm0, %v652_v8 }
 0x1a3   :  { %v653_v13 = vmax.f32 %v549_v11, 0.0  ;;  %v564_v15 = vadd.f32 %v1255_v12, %v1575_v54 }
 0x1a4   :  { %v558_v16 = vpop.f32.mrf.mxu1 }
 0x1a5   :  { %v559_v17 = vadd.f32 %v1575_v54, %v558_v16  ;;  %1297 = vmatprep.mubr.msk.f32.mxu0 %vm63_vm0, %v653_v13  ;;  %v656_v20 = vmax.f32 %v564_v15, 0.0 }
 0x1a6   :  { %v1258_v18 = vpop.f32.mrf.mxu1  ;;  %1298 = vmatmul.mubr.msk.f32.gmra.mxu0 %vm63_vm0, %v654_v14 }
 0x1a7   :  { %v655_v19 = vmax.f32 %v559_v17, 0.0  ;;  %v574_v21 = vadd.f32 %v1258_v18, %v1575_v54 }
 0x1a8   :  { %v568_v22 = vpop.f32.mrf.mxu1 }
 0x1a9   :  { %v569_v23 = vadd.f32 %v1575_v54, %v568_v22  ;;  %1300 = vmatprep.mubr.msk.f32.mxu0 %vm63_vm0, %v655_v19  ;;  %v658_v26 = vmax.f32 %v574_v21, 0.0 }
 0x1aa   :  { %v1261_v24 = vpop.f32.mrf.mxu1  ;;  %1301 = vmatmul.mubr.msk.f32.gmra.mxu0 %vm63_vm0, %v656_v20 }
 0x1ab   :  { %v657_v25 = vmax.f32 %v569_v23, 0.0  ;;  %v584_v27 = vadd.f32 %v1261_v24, %v1575_v54 }
 0x1ac   :  { %v578_v28 = vpop.f32.mrf.mxu1 }
 0x1ad   :  { %v579_v29 = vadd.f32 %v1575_v54, %v578_v28  ;;  %1303 = vmatprep.mubr.msk.f32.mxu0 %vm63_vm0, %v657_v25  ;;  %v660_v32 = vmax.f32 %v584_v27, 0.0 }
 0x1ae   :  { %v1264_v30 = vpop.f32.mrf.mxu1  ;;  %1304 = vmatmul.mubr.msk.f32.gmra.mxu0 %vm63_vm0, %v658_v26 }
 0x1af   :  { %v659_v31 = vmax.f32 %v579_v29, 0.0  ;;  %v594_v33 = vadd.f32 %v1264_v30, %v1575_v54 }
 0x1b0   :  { %v588_v34 = vpop.f32.mrf.mxu1 }
 0x1b1   :  { %v589_v35 = vadd.f32 %v1575_v54, %v588_v34  ;;  %1306 = vmatprep.mubr.msk.f32.mxu0 %vm63_vm0, %v659_v31  ;;  %v662_v39 = vmax.f32 %v594_v33, 0.0 }
 0x1b2   :  { %v1267_v36 = vpop.f32.mrf.mxu1  ;;  %1307 = vmatmul.mubr.msk.f32.gmra.mxu0 %vm63_vm0, %v660_v32 }
 0x1b3   :  { %v661_v38 = vmax.f32 %v589_v35, 0.0  ;;  %v604_v40 = vadd.f32 %v1267_v36, %v1575_v54 }
 0x1b4   :  { %v598_v41 = vpop.f32.mrf.mxu1 }
 0x1b5   :  { %v599_v42 = vadd.f32 %v1575_v54, %v598_v41  ;;  %1309 = vmatprep.mubr.msk.f32.mxu0 %vm63_vm0, %v661_v38  ;;  %v664_v45 = vmax.f32 %v604_v40, 0.0 }
 0x1b6   :  { %v1270_v43 = vpop.f32.mrf.mxu1  ;;  %1310 = vmatmul.mubr.msk.f32.gmra.mxu0 %vm63_vm0, %v662_v39 }
 0x1b7   :  { %v663_v44 = vmax.f32 %v599_v42, 0.0  ;;  %v614_v46 = vadd.f32 %v1270_v43, %v1575_v54 }
 0x1b8   :  { %v608_v47 = vpop.f32.mrf.mxu1 }
 0x1b9   :  { %v609_v48 = vadd.f32 %v1575_v54, %v608_v47  ;;  %1312 = vmatprep.mubr.msk.f32.mxu0 %vm63_vm0, %v663_v44  ;;  %v666_v51 = vmax.f32 %v614_v46, 0.0 }
 0x1ba   :  { %v1273_v49 = vpop.f32.mrf.mxu1  ;;  %1313 = vmatmul.mubr.msk.f32.gmra.mxu0 %vm63_vm0, %v664_v45 }
 0x1bb   :  { %v665_v50 = vmax.f32 %v609_v48, 0.0  ;;  %v624_v52 = vadd.f32 %v1273_v49, %v1575_v54 }
 0x1bc   :  { %v618_v53 = vpop.f32.mrf.mxu1 }
 0x1bd   :  { %v619_v55 = vadd.f32 %v1575_v54, %v618_v53  ;;  %1315 = vmatprep.mubr.msk.f32.mxu0 %vm63_vm0, %v665_v50  ;;  %v668_v57 = vmax.f32 %v624_v52, 0.0 }
 0x1be   :  { %v1276_v37 = vpop.f32.mrf.mxu1  ;;  %1316 = vmatmul.mubr.msk.f32.gmra.mxu0 %vm63_vm0, %v666_v51 }
 0x1bf   :  { %v667_v56 = vmax.f32 %v619_v55, 0.0  ;;  %v634_v58 = vadd.f32 %v1276_v37, %v1575_v54 }
 0x1c0   :  { %v628_v59 = vpop.f32.mrf.mxu1 }
 0x1c1   :  { %v629_v60 = vadd.f32 %v1575_v54, %v628_v59  ;;  %1318 = vmatprep.mubr.msk.f32.mxu0 %vm63_vm0, %v667_v56  ;;  %v670_v63 = vmax.f32 %v634_v58, 0.0 }
 0x1c2   :  { %v1279_v61 = vpop.f32.mrf.mxu1  ;;  %1319 = vmatmul.mubr.msk.f32.gmra.mxu0 %vm63_vm0, %v668_v57 }
 0x1c3   :  { %v669_v62 = vmax.f32 %v629_v60, 0.0  ;;  %v644_v0 = vadd.f32 %v1279_v61, %v1575_v54 }
 0x1c4   :  { %v638_v1 = vpop.f32.mrf.mxu1 }
 0x1c5   :  { %v639_v2 = vadd.f32 %v1575_v54, %v638_v1  ;;  %1321 = vmatprep.mubr.msk.f32.mxu0 %vm63_vm0, %v669_v62  ;;  %v672_v4 = vmax.f32 %v644_v0, 0.0 }
 0x1c6   :  { %1322 = vmatmul.mubr.msk.f32.gmra.mxu0 %vm63_vm0, %v670_v63 }
 0x1c7   :  { %v671_v3 = vmax.f32 %v639_v2, 0.0 }
 0x1c9   :  { %1324 = vmatprep.mubr.msk.f32.mxu0 %vm63_vm0, %v671_v3 }
 0x1ca   :  { %1325 = vmatmul.mubr.msk.f32.gmra.mxu0 %vm63_vm0, %v672_v4 }
 0x25a   :  { %v1290_v6 = vpop.f32.mrf.mxu0 }
 0x25b   :  { %v834_v7 = vadd.f32 %v1290_v6, %v1632_v5 }
 0x25c   :  { %v828_v54 = vpop.f32.mrf.mxu0 }
 0x25d   :  { %v958_v8 = vmax.f32 %v834_v7, 0.0  ;;  %v829_v9 = vadd.f32 %v1632_v5, %v828_v54 }
 0x25e   :  { %v1293_v10 = vpop.f32.mrf.mxu0 }
 0x25f   :  { %985 = vst.msk [vmem:[%s1770_s7 + $0x8] sm:$0xff] %vm983_vm1, %v958_v8  ;;  %v957_v11 = vmax.f32 %v829_v9, 0.0  ;;  %v844_v12 = vadd.f32 %v1293_v10, %v1632_v5 }
 0x260   :  { %v838_v13 = vpop.f32.mrf.mxu0 }
 0x261   :  { %984 = vst.msk [vmem:[%s1770_s7] sm:$0xff] %vm983_vm1, %v957_v11  ;;  %v960_v14 = vmax.f32 %v844_v12, 0.0  ;;  %v839_v15 = vadd.f32 %v1632_v5, %v838_v13 }
 0x262   :  { %v1296_v16 = vpop.f32.mrf.mxu0 }
 0x263   :  { %987 = vst.msk [vmem:[%s1770_s7 + $0x18] sm:$0xff] %vm983_vm1, %v960_v14  ;;  %v959_v17 = vmax.f32 %v839_v15, 0.0  ;;  %v854_v18 = vadd.f32 %v1296_v16, %v1632_v5 }
 0x264   :  { %v848_v19 = vpop.f32.mrf.mxu0 }
 0x265   :  { %986 = vst.msk [vmem:[%s1770_s7 + $0x10] sm:$0xff] %vm983_vm1, %v959_v17  ;;  %v962_v20 = vmax.f32 %v854_v18, 0.0  ;;  %v849_v21 = vadd.f32 %v1632_v5, %v848_v19 }
 0x266   :  { %v1299_v22 = vpop.f32.mrf.mxu0 }
 0x267   :  { %989 = vst.msk [vmem:[%s1770_s7 + $0x28] sm:$0xff] %vm983_vm1, %v962_v20  ;;  %v961_v23 = vmax.f32 %v849_v21, 0.0  ;;  %v864_v24 = vadd.f32 %v1299_v22, %v1632_v5 }
 0x268   :  { %v858_v25 = vpop.f32.mrf.mxu0 }
 0x269   :  { %988 = vst.msk [vmem:[%s1770_s7 + $0x20] sm:$0xff] %vm983_vm1, %v961_v23  ;;  %v964_v26 = vmax.f32 %v864_v24, 0.0  ;;  %v859_v27 = vadd.f32 %v1632_v5, %v858_v25 }
 0x26a   :  { %v1302_v28 = vpop.f32.mrf.mxu0 }
 0x26b   :  { %991 = vst.msk [vmem:[%s1770_s7 + $0x38] sm:$0xff] %vm983_vm1, %v964_v26  ;;  %v963_v29 = vmax.f32 %v859_v27, 0.0  ;;  %v874_v30 = vadd.f32 %v1302_v28, %v1632_v5 }
 0x26c   :  { %v868_v31 = vpop.f32.mrf.mxu0 }
 0x26d   :  { %990 = vst.msk [vmem:[%s1770_s7 + $0x30] sm:$0xff] %vm983_vm1, %v963_v29  ;;  %v966_v32 = vmax.f32 %v874_v30, 0.0  ;;  %v869_v33 = vadd.f32 %v1632_v5, %v868_v31 }
 0x26e   :  { %v1305_v34 = vpop.f32.mrf.mxu0 }
 0x26f   :  { %993 = vst.msk [vmem:[%s1770_s7 + $0x48] sm:$0xff] %vm983_vm1, %v966_v32  ;;  %v965_v35 = vmax.f32 %v869_v33, 0.0  ;;  %v884_v36 = vadd.f32 %v1305_v34, %v1632_v5 }
 0x270   :  { %v878_v38 = vpop.f32.mrf.mxu0 }
 0x271   :  { %992 = vst.msk [vmem:[%s1770_s7 + $0x40] sm:$0xff] %vm983_vm1, %v965_v35  ;;  %v968_v39 = vmax.f32 %v884_v36, 0.0  ;;  %v879_v40 = vadd.f32 %v1632_v5, %v878_v38 }
 0x272   :  { %v1308_v41 = vpop.f32.mrf.mxu0 }
 0x273   :  { %995 = vst.msk [vmem:[%s1770_s7 + $0x58] sm:$0xff] %vm983_vm1, %v968_v39  ;;  %v967_v42 = vmax.f32 %v879_v40, 0.0  ;;  %v894_v43 = vadd.f32 %v1308_v41, %v1632_v5 }
 0x274   :  { %v888_v44 = vpop.f32.mrf.mxu0 }
 0x275   :  { %994 = vst.msk [vmem:[%s1770_s7 + $0x50] sm:$0xff] %vm983_vm1, %v967_v42  ;;  %v970_v45 = vmax.f32 %v894_v43, 0.0  ;;  %v889_v46 = vadd.f32 %v1632_v5, %v888_v44 }
 0x276   :  { %v1311_v47 = vpop.f32.mrf.mxu0 }
 0x277   :  { %997 = vst.msk [vmem:[%s1770_s7 + $0x68] sm:$0xff] %vm983_vm1, %v970_v45  ;;  %v969_v48 = vmax.f32 %v889_v46, 0.0  ;;  %v904_v49 = vadd.f32 %v1311_v47, %v1632_v5 }
 0x278   :  { %v898_v50 = vpop.f32.mrf.mxu0 }
 0x279   :  { %996 = vst.msk [vmem:[%s1770_s7 + $0x60] sm:$0xff] %vm983_vm1, %v969_v48  ;;  %v972_v51 = vmax.f32 %v904_v49, 0.0  ;;  %v899_v52 = vadd.f32 %v1632_v5, %v898_v50 }
 0x27a   :  { %v1314_v53 = vpop.f32.mrf.mxu0 }
 0x27b   :  { %999 = vst.msk [vmem:[%s1770_s7 + $0x78] sm:$0xff] %vm983_vm1, %v972_v51  ;;  %v971_v55 = vmax.f32 %v899_v52, 0.0  ;;  %v914_v37 = vadd.f32 %v1314_v53, %v1632_v5 }
 0x27c   :  { %v908_v56 = vpop.f32.mrf.mxu0 }
 0x27d   :  { %998 = vst.msk [vmem:[%s1770_s7 + $0x70] sm:$0xff] %vm983_vm1, %v971_v55  ;;  %v974_v57 = vmax.f32 %v914_v37, 0.0  ;;  %v909_v58 = vadd.f32 %v1632_v5, %v908_v56 }
 0x27e   :  { %v1317_v59 = vpop.f32.mrf.mxu0 }
 0x27f   :  { %1001 = vst.msk [vmem:[%s1770_s7 + $0x88] sm:$0xff] %vm983_vm1, %v974_v57  ;;  %v973_v60 = vmax.f32 %v909_v58, 0.0  ;;  %v924_v61 = vadd.f32 %v1317_v59, %v1632_v5 }
 0x280   :  { %v918_v62 = vpop.f32.mrf.mxu0 }
 0x281   :  { %1000 = vst.msk [vmem:[%s1770_s7 + $0x80] sm:$0xff] %vm983_vm1, %v973_v60  ;;  %v976_v63 = vmax.f32 %v924_v61, 0.0  ;;  %v919_v0 = vadd.f32 %v1632_v5, %v918_v62 }
 0x282   :  { %v1320_v1 = vpop.f32.mrf.mxu0 }
 0x283   :  { %1003 = vst.msk [vmem:[%s1770_s7 + $0x98] sm:$0xff] %vm983_vm1, %v976_v63  ;;  %v975_v2 = vmax.f32 %v919_v0, 0.0  ;;  %v934_v3 = vadd.f32 %v1320_v1, %v1632_v5 }
 0x284   :  { %v928_v4 = vpop.f32.mrf.mxu0 }
 0x285   :  { %1002 = vst.msk [vmem:[%s1770_s7 + $0x90] sm:$0xff] %vm983_vm1, %v975_v2  ;;  %v978_v6 = vmax.f32 %v934_v3, 0.0  ;;  %v929_v7 = vadd.f32 %v1632_v5, %v928_v4 }
 0x286   :  { %v1323_v54 = vpop.f32.mrf.mxu0 }
 0x287   :  { %1005 = vst.msk [vmem:[%s1770_s7 + $0xa8] sm:$0xff] %vm983_vm1, %v978_v6  ;;  %v977_v8 = vmax.f32 %v929_v7, 0.0  ;;  %v944_v9 = vadd.f32 %v1323_v54, %v1632_v5 }
 0x288   :  { %v938_v10 = vpop.f32.mrf.mxu0 }
 0x289   :  { %1004 = vst.msk [vmem:[%s1770_s7 + $0xa0] sm:$0xff] %vm983_vm1, %v977_v8  ;;  %v980_v11 = vmax.f32 %v944_v9, 0.0  ;;  %v939_v12 = vadd.f32 %v1632_v5, %v938_v10 }
 0x28a   :  { %v1326_v13 = vpop.f32.mrf.mxu0 }
 0x28b   :  { %1007 = vst.msk [vmem:[%s1770_s7 + $0xb8] sm:$0xff] %vm983_vm1, %v980_v11  ;;  %v979_v14 = vmax.f32 %v939_v12, 0.0  ;;  %v954_v15 = vadd.f32 %v1326_v13, %v1632_v5 }
 0x28c   :  { %v948_v16 = vpop.f32.mrf.mxu0 }
 0x28d   :  { %1006 = vst.msk [vmem:[%s1770_s7 + $0xb0] sm:$0xff] %vm983_vm1, %v979_v14  ;;  %v982_v17 = vmax.f32 %v954_v15, 0.0  ;;  %v949_v18 = vadd.f32 %v1632_v5, %v948_v16 }
 0x28f   :  { %1010 = vst.msk [vmem:[%s1770_s7 + $0xc8] sm:$0x7] %vm1009_vm2, %v982_v17  ;;  %v981_v19 = vmax.f32 %v949_v18, 0.0 }
 0x291   :  { %1008 = vst.msk [vmem:[%s1770_s7 + $0xc0] sm:$0xff] %vm983_vm1, %v981_v19 }

</bundles_post_ra>
